<compile_context>
chip_gen: v6e
topology: v6e:2x2x1
jax: 0.10.0
libtpu: 0.0.40
codegen_flags: <defaults>
</compile_context>

<pallas_src>
import math
from functools import partial

import jax
import jax.numpy as jnp
from jax.experimental import pallas as pl
from jax.experimental.pallas import tpu as pltpu

LN_EPS = 1e-5                      # PyTorch nn.LayerNorm default
_VMEM_LIMIT = 48 * 1024 * 1024     # above 32 MiB default, below all physical limits


# ----------------------------- in-kernel helpers -----------------------------

def _layer_norm(x, w, b):
    mu = jnp.mean(x, axis=-1, keepdims=True)
    var = jnp.mean((x - mu) ** 2, axis=-1, keepdims=True)
    return (x - mu) * jax.lax.rsqrt(var + LN_EPS) * w + b


def _gelu_exact(x):
    # nn.GELU() default: exact erf formulation
    return 0.5 * x * (1.0 + jax.lax.erf(x / math.sqrt(2.0)))


def _arr_bytes(*objs):
    return sum(int(math.prod(o.shape)) * jnp.dtype(o.dtype).itemsize for o in objs)


def _pick_row_tile(m, pref=256):
    if m <= pref:
        return m
    for t in (pref, 128, 64, 32, 16, 8):
        if m % t == 0:
            return t
    return m


# --------------------------------- kernels -----------------------------------

def _matmul_bias_kernel(x_ref, w_ref, b_ref, o_ref):
    # x @ w + b, bf16 operands, f32 accumulation.
    o_ref[...] = (
        jnp.dot(x_ref[...].astype(w_ref.dtype), w_ref[...],
                preferred_element_type=jnp.float32)
        + b_ref[...]
    ).astype(o_ref.dtype)


def _ln_matmul_bias_kernel(x_ref, lnw_ref, lnb_ref, w_ref, b_ref, o_ref):
    # LayerNorm(x) @ w + b  (used for QKV projection and final norm + head).
    x = x_ref[...].astype(jnp.float32)
    h = _layer_norm(x, lnw_ref[...], lnb_ref[...])
    o_ref[...] = (
        jnp.dot(h.astype(w_ref.dtype), w_ref[...],
                preferred_element_type=jnp.float32)
        + b_ref[...]
    ).astype(o_ref.dtype)


def _attention_kernel(q_ref, k_ref, v_ref, o_ref, *, scale):
    # One grid step = one image; all heads batched in a single einsum.
    q = q_ref[0]                                        # (H, N, dh) bf16
    k = k_ref[0]
    v = v_ref[0]
    s = jnp.einsum("hnd,hmd->hnm", q, k,
                   preferred_element_type=jnp.float32) * scale
    s = s - jnp.max(s, axis=-1, keepdims=True)
    p = jnp.exp(s)
    p = p * pl.reciprocal(jnp.sum(p, axis=-1, keepdims=True), approx=True)
    ctx = jnp.einsum("hnm,hmd->hnd", p.astype(v.dtype), v,
                     preferred_element_type=jnp.float32)
    o_ref[0] = ctx.astype(o_ref.dtype)


def _proj_mlp_kernel(x_ref, ctx_ref, projw, projb, ln2w, ln2b,
                     fc1w, fc1b, fc2w, fc2b, o_ref):
    # x + proj(ctx); then x + fc2(gelu(fc1(LN2(x)))). Residual stream in f32.
    x = x_ref[...].astype(jnp.float32)
    att = jnp.dot(ctx_ref[...], projw[...],
                  preferred_element_type=jnp.float32) + projb[...]
    x = x + att
    h = _layer_norm(x, ln2w[...], ln2b[...])
    h = jnp.dot(h.astype(fc1w.dtype), fc1w[...],
                preferred_element_type=jnp.float32) + fc1b[...]
    h = _gelu_exact(h)
    h = jnp.dot(h.astype(fc2w.dtype), fc2w[...],
                preferred_element_type=jnp.float32) + fc2b[...]
    o_ref[...] = (x + h).astype(o_ref.dtype)


# --------------------------------- wrappers -----------------------------------

def _full2d(a):
    return pl.BlockSpec(a.shape, lambda i: (0, 0))


def matmul_bias(x, w, b, out_dtype=None):
    M, K = x.shape
    N = w.shape[1]
    out_dtype = out_dtype or x.dtype
    tm = _pick_row_tile(M)
    out_sds = jax.ShapeDtypeStruct((M, N), out_dtype)
    return pl.pallas_call(
        _matmul_bias_kernel,
        out_shape=out_sds,
        grid=(M // tm,),
        in_specs=[pl.BlockSpec((tm, K), lambda i: (i, 0)), _full2d(w), _full2d(b)],
        out_specs=pl.BlockSpec((tm, N), lambda i: (i, 0)),
        compiler_params=pltpu.CompilerParams(
            dimension_semantics=("parallel",), vmem_limit_bytes=_VMEM_LIMIT),
        cost_estimate=pl.CostEstimate(
            flops=2 * M * K * N, transcendentals=0,
            bytes_accessed=_arr_bytes(x, w, b, out_sds)),
    )(x, w, b)


def ln_matmul_bias(x, ln_w, ln_b, w, b, out_dtype=None):
    M, K = x.shape
    N = w.shape[1]
    out_dtype = out_dtype or x.dtype
    tm = _pick_row_tile(M)
    out_sds = jax.ShapeDtypeStruct((M, N), out_dtype)
    return pl.pallas_call(
        _ln_matmul_bias_kernel,
        out_shape=out_sds,
        grid=(M // tm,),
        in_specs=[pl.BlockSpec((tm, K), lambda i: (i, 0)),
                  _full2d(ln_w), _full2d(ln_b), _full2d(w), _full2d(b)],
        out_specs=pl.BlockSpec((tm, N), lambda i: (i, 0)),
        compiler_params=pltpu.CompilerParams(
            dimension_semantics=("parallel",), vmem_limit_bytes=_VMEM_LIMIT),
        cost_estimate=pl.CostEstimate(
            flops=2 * M * K * N + 8 * M * K, transcendentals=M,
            bytes_accessed=_arr_bytes(x, ln_w, ln_b, w, b, out_sds)),
    )(x, ln_w, ln_b, w, b)


def attention(q, k, v):
    B, H, N, dh = q.shape
    scale = dh ** (-0.5)
    spec = pl.BlockSpec((1, H, N, dh), lambda b: (b, 0, 0, 0))
    out_sds = jax.ShapeDtypeStruct((B, H, N, dh), q.dtype)
    return pl.pallas_call(
        partial(_attention_kernel, scale=scale),
        out_shape=out_sds,
        grid=(B,),
        in_specs=[spec, spec, spec],
        out_specs=spec,
        compiler_params=pltpu.CompilerParams(
            dimension_semantics=("parallel",), vmem_limit_bytes=_VMEM_LIMIT),
        cost_estimate=pl.CostEstimate(
            flops=4 * B * H * N * N * dh,
            transcendentals=B * H * N * (N + 1),
            bytes_accessed=_arr_bytes(q, k, v, out_sds)),
    )(q, k, v)


def proj_mlp(x, ctx, p):
    M, C = x.shape
    hidden = p["fc1_w"].shape[1]
    tm = _pick_row_tile(M)
    params = [p["proj_w"], p["proj_b"], p["ln2_w"], p["ln2_b"],
              p["fc1_w"], p["fc1_b"], p["fc2_w"], p["fc2_b"]]
    row_spec = pl.BlockSpec((tm, C), lambda i: (i, 0))
    out_sds = jax.ShapeDtypeStruct((M, C), x.dtype)
    return pl.pallas_call(
        _proj_mlp_kernel,
        out_shape=out_sds,
        grid=(M // tm,),
        in_specs=[row_spec, row_spec] + [_full2d(a) for a in params],
        out_specs=row_spec,
        compiler_params=pltpu.CompilerParams(
            dimension_semantics=("parallel",), vmem_limit_bytes=_VMEM_LIMIT),
        cost_estimate=pl.CostEstimate(
            flops=2 * M * C * C + 4 * M * C * hidden,
            transcendentals=M * (hidden + 1),
            bytes_accessed=_arr_bytes(x, ctx, *params, out_sds)),
    )(x, ctx, *params)


def encoder_block(x, p, *, num_heads):
    B, N, C = x.shape
    H = num_heads
    dh = C // H
    x2 = x.reshape(B * N, C)                                   # flatten batch into M

    # LN1 + QKV on the whole (B*N, C) token slab; output bf16 to halve HBM traffic.
    qkv = ln_matmul_bias(x2, p["ln1_w"], p["ln1_b"], p["qkv_w"], p["qkv_b"],
                         out_dtype=jnp.bfloat16)
    # Head split is layout plumbing done in plain JAX (mirrors the PyTorch permute).
    qkv = qkv.reshape(B, N, 3, H, dh).transpose(2, 0, 3, 1, 4)  # (3, B, H, N, dh)
    q, k, v = qkv[0], qkv[1], qkv[2]

    ctx = attention(q, k, v)                                    # (B, H, N, dh) bf16
    ctx = ctx.transpose(0, 2, 1, 3).reshape(B * N, C)           # (B*N, C) bf16

    out = proj_mlp(x2, ctx, p)                                  # (B*N, C) f32
    return out.reshape(B, N, C)


def vit_head(cls_tokens, norm_w, norm_b, head_w, head_b):
    B, C = cls_tokens.shape
    ncls = head_w.shape[1]
    ncls_pad = max(128, ((ncls + 127) // 128) * 128)            # lane-dense output
    w = jnp.zeros((C, ncls_pad), head_w.dtype).at[:, :ncls].set(head_w)
    b = jnp.zeros((1, ncls_pad), head_b.dtype).at[:, :ncls].set(head_b)
    out = ln_matmul_bias(cls_tokens, norm_w, norm_b, w, b, out_dtype=jnp.float32)
    return out[:, :ncls]


def vit_forward(x, params, *, patch_size, num_heads):
    B, Cin, Himg, Wimg = x.shape
    P = patch_size
    nH, nW = Himg // P, Wimg // P
    # Conv2d(kernel=stride=P) == patch extraction + matmul.
    patches = (
        x.reshape(B, Cin, nH, P, nW, P)
        .transpose(0, 2, 4, 1, 3, 5)                            # (B, nH, nW, Cin, P, P)
        .reshape(B * nH * nW, Cin * P * P)
    )
    E = params["patch_w"].shape[1]
    tok = matmul_bias(patches, params["patch_w"], params["patch_b"],
                      out_dtype=jnp.float32).reshape(B, nH * nW, E)

    cls = jnp.broadcast_to(params["cls_token"], (B, 1, E))
    xt = jnp.concatenate([cls, tok], axis=1) + params["pos_embed"]

    for blk in params["blocks"]:
        xt = encoder_block(xt, blk, num_heads=num_heads)

    cls_final = xt[:, 0, :]                                     # only cls token to head
    return vit_head(cls_final, params["norm_w"], params["norm_b"],
                    params["head_w"], params["head_b"])


# -------------------------------- param init ----------------------------------

def init_params(key, *, in_channels, patch_size, num_patches, embed_dim,
                depth, mlp_ratio, num_classes):
    n_keys = 4 + depth * 4
    keys = iter(jax.random.split(key, n_keys))

    def tn(shape, std=0.02, dtype=jnp.float32):
        w = jax.random.truncated_normal(next(keys), -2.0, 2.0, shape, jnp.float32)
        return (w * std).astype(dtype)

    cpp = in_channels * patch_size * patch_size
    hidden = int(embed_dim * mlp_ratio)
    N = num_patches + 1  # +cls token
    bf16 = jnp.bfloat16

    params = {
        # matmul weights stored bf16 (MXU-native), everything else f32
        "patch_w": tn((cpp, embed_dim), dtype=bf16),
        "patch_b": jnp.zeros((1, embed_dim), jnp.float32),
        "cls_token": tn((1, 1, embed_dim)),
        "pos_embed": tn((1, N, embed_dim)),
        "norm_w": jnp.ones((1, embed_dim), jnp.float32),
        "norm_b": jnp.zeros((1, embed_dim), jnp.float32),
        "head_w": tn((embed_dim, num_classes), dtype=bf16),
        "head_b": jnp.zeros((1, num_classes), jnp.float32),
        "blocks": [],
    }
    for _ in range(depth):
        params["blocks"].append({
            "ln1_w": jnp.ones((1, embed_dim), jnp.float32),
            "ln1_b": jnp.zeros((1, embed_dim), jnp.float32),
            "qkv_w": tn((embed_dim, 3 * embed_dim), dtype=bf16),   # qkv_bias=True
            "qkv_b": jnp.zeros((1, 3 * embed_dim), jnp.float32),
            "proj_w": tn((embed_dim, embed_dim), dtype=bf16),
            "proj_b": jnp.zeros((1, embed_dim), jnp.float32),
            "ln2_w": jnp.ones((1, embed_dim), jnp.float32),
            "ln2_b": jnp.zeros((1, embed_dim), jnp.float32),
            "fc1_w": tn((embed_dim, hidden), dtype=bf16),
            "fc1_b": jnp.zeros((1, hidden), jnp.float32),
            "fc2_w": tn((hidden, embed_dim), dtype=bf16),
            "fc2_b": jnp.zeros((1, embed_dim), jnp.float32),
        })
    return params


# ----------------------------------- main --------------------------------------

if __name__ == "__main__":
    # small, forward-consistent config
    B, C_in, IMG = 2, 3, 16
    PATCH = 4
    EMBED = 64
    HEADS = 4
    DEPTH = 2
    NCLS = 10
    MLP_RATIO = 4.0
    NUM_PATCHES = (IMG // PATCH) ** 2

    key = jax.random.PRNGKey(0)
    kx, kp = jax.random.split(key)
    x = jax.random.normal(kx, (B, C_in, IMG, IMG), jnp.float32)  # NCHW like PyTorch

    params = init_params(
        kp, in_channels=C_in, patch_size=PATCH, num_patches=NUM_PATCHES,
        embed_dim=EMBED, depth=DEPTH, mlp_ratio=MLP_RATIO, num_classes=NCLS,
    )

    fwd = jax.jit(partial(vit_forward, patch_size=PATCH, num_heads=HEADS))
    logits = fwd(x, params)
    jax.block_until_ready(logits)
    assert logits.shape == (B, NCLS), logits.shape
    assert bool(jnp.all(jnp.isfinite(logits.astype(jnp.float32))))
    print("KERNEL_OK")
</pallas_src>

<mosaic_0001>
module attributes {stable_mosaic.version = 11 : i64} {
  func.func @_matmul_bias_kernel(%arg0: i32, %arg1: memref<32x48xf32, #tpu.memory_space<vmem>>, %arg2: memref<48x64xbf16, #tpu.memory_space<vmem>>, %arg3: memref<1x64xf32, #tpu.memory_space<vmem>>, %arg4: memref<32x64xf32, #tpu.memory_space<vmem>>) attributes {dimension_semantics = [#tpu.dimension_semantics<parallel>], iteration_bounds = array<i64: 1>, scalar_prefetch = 0 : i64, scratch_operands = 0 : i64, tpu.core_type = #tpu.core_type<tc>, window_params = [{transform_indices = @transform_0, window_bounds = array<i64: 32, 48>}, {pipeline_mode = #tpu.pipeline_mode<synchronous>, transform_indices = @transform_1, window_bounds = array<i64: 48, 64>}, {pipeline_mode = #tpu.pipeline_mode<synchronous>, transform_indices = @transform_2, window_bounds = array<i64: 1, 64>}, {transform_indices = @transform_3, window_bounds = array<i64: 32, 64>}]} {
    %c0 = arith.constant 0 : index
    %c0_0 = arith.constant 0 : index
    %0 = vector.load %arg1[%c0, %c0_0] : memref<32x48xf32, #tpu.memory_space<vmem>>, vector<32x48xf32>
    %1 = arith.truncf %0 : vector<32x48xf32> to vector<32x48xbf16>
    %c0_1 = arith.constant 0 : index
    %c0_2 = arith.constant 0 : index
    %2 = vector.load %arg2[%c0_1, %c0_2] : memref<48x64xbf16, #tpu.memory_space<vmem>>, vector<48x64xbf16>
    %cst = arith.constant dense<0.000000e+00> : vector<32x64xf32>
    %3 = tpu.matmul %1, %2, %cst {dimension_numbers = #tpu.dot_dimension_numbers<[1], [0], [0], [1], [0, 0, 1, 1], [], []>} : vector<32x48xbf16>, vector<48x64xbf16>, vector<32x64xf32> -> vector<32x64xf32>
    %c0_3 = arith.constant 0 : index
    %c0_4 = arith.constant 0 : index
    %4 = vector.load %arg3[%c0_3, %c0_4] : memref<1x64xf32, #tpu.memory_space<vmem>>, vector<1x64xf32>
    %5 = vector.broadcast %4 : vector<1x64xf32> to vector<32x64xf32>
    %6 = arith.addf %3, %5 : vector<32x64xf32>
    %c0_5 = arith.constant 0 : index
    %c0_6 = arith.constant 0 : index
    %7 = vector.load %arg4[%c0_5, %c0_6] : memref<32x64xf32, #tpu.memory_space<vmem>>, vector<32x64xf32>
    tpu.vector_store %arg4[%c0_5, %c0_6], %6 {strides = array<i32>} : memref<32x64xf32, #tpu.memory_space<vmem>>, vector<32x64xf32>,
    return
  }
  func.func @transform_0(%arg0: i32) -> (i32, i32) {
    %c0_i32 = arith.constant 0 : i32
    %c0_i32_0 = arith.constant 0 : i32
    return %arg0, %c0_i32 : i32, i32
  }
  func.func @transform_1(%arg0: i32) -> (i32, i32) {
    %c0_i32 = arith.constant 0 : i32
    %c0_i32_0 = arith.constant 0 : i32
    %c0_i32_1 = arith.constant 0 : i32
    return %c0_i32, %c0_i32_0 : i32, i32
  }
  func.func @transform_2(%arg0: i32) -> (i32, i32) {
    %c0_i32 = arith.constant 0 : i32
    %c0_i32_0 = arith.constant 0 : i32
    %c0_i32_1 = arith.constant 0 : i32
    return %c0_i32, %c0_i32_0 : i32, i32
  }
  func.func @transform_3(%arg0: i32) -> (i32, i32) {
    %c0_i32 = arith.constant 0 : i32
    %c0_i32_0 = arith.constant 0 : i32
    return %arg0, %c0_i32 : i32, i32
  }
}

module attributes {stable_mosaic.version = 11 : i64} {
  func.func @_ln_matmul_bias_kernel(%arg0: i32, %arg1: memref<34x64xf32, #tpu.memory_space<vmem>>, %arg2: memref<1x64xf32, #tpu.memory_space<vmem>>, %arg3: memref<1x64xf32, #tpu.memory_space<vmem>>, %arg4: memref<64x192xbf16, #tpu.memory_space<vmem>>, %arg5: memref<1x192xf32, #tpu.memory_space<vmem>>, %arg6: memref<34x192xbf16, #tpu.memory_space<vmem>>) attributes {dimension_semantics = [#tpu.dimension_semantics<parallel>], iteration_bounds = array<i64: 1>, scalar_prefetch = 0 : i64, scratch_operands = 0 : i64, tpu.core_type = #tpu.core_type<tc>, window_params = [{transform_indices = @transform_0, window_bounds = array<i64: 34, 64>}, {pipeline_mode = #tpu.pipeline_mode<synchronous>, transform_indices = @transform_1, window_bounds = array<i64: 1, 64>}, {pipeline_mode = #tpu.pipeline_mode<synchronous>, transform_indices = @transform_2, window_bounds = array<i64: 1, 64>}, {pipeline_mode = #tpu.pipeline_mode<synchronous>, transform_indices = @transform_3, window_bounds = array<i64: 64, 192>}, {pipeline_mode = #tpu.pipeline_mode<synchronous>, transform_indices = @transform_4, window_bounds = array<i64: 1, 192>}, {transform_indices = @transform_5, window_bounds = array<i64: 34, 192>}]} {
    %c0 = arith.constant 0 : index
    %c0_0 = arith.constant 0 : index
    %0 = vector.load %arg1[%c0, %c0_0] : memref<34x64xf32, #tpu.memory_space<vmem>>, vector<34x64xf32>
    %c0_1 = arith.constant 0 : index
    %c0_2 = arith.constant 0 : index
    %1 = vector.load %arg2[%c0_1, %c0_2] : memref<1x64xf32, #tpu.memory_space<vmem>>, vector<1x64xf32>
    %c0_3 = arith.constant 0 : index
    %c0_4 = arith.constant 0 : index
    %2 = vector.load %arg3[%c0_3, %c0_4] : memref<1x64xf32, #tpu.memory_space<vmem>>, vector<1x64xf32>
    %cst = arith.constant dense<0.000000e+00> : vector<34xf32>
    %3 = vector.multi_reduction <add>, %0, %cst [1] : vector<34x64xf32> to vector<34xf32>
    %4 = vector.shape_cast %3 : vector<34xf32> to vector<34x1xf32>
    %cst_5 = arith.constant 6.400000e+01 : f32
    %5 = vector.broadcast %cst_5 : f32 to vector<34x1xf32>
    %6 = arith.divf %4, %5 : vector<34x1xf32>
    %7 = vector.broadcast %6 : vector<34x1xf32> to vector<34x64xf32>
    %8 = arith.subf %0, %7 : vector<34x64xf32>
    %9 = arith.mulf %8, %8 : vector<34x64xf32>
    %cst_6 = arith.constant dense<0.000000e+00> : vector<34xf32>
    %10 = vector.multi_reduction <add>, %9, %cst_6 [1] : vector<34x64xf32> to vector<34xf32>
    %11 = vector.shape_cast %10 : vector<34xf32> to vector<34x1xf32>
    %cst_7 = arith.constant 6.400000e+01 : f32
    %12 = vector.broadcast %cst_7 : f32 to vector<34x1xf32>
    %13 = arith.divf %11, %12 : vector<34x1xf32>
    %14 = vector.broadcast %6 : vector<34x1xf32> to vector<34x64xf32>
    %15 = arith.subf %0, %14 : vector<34x64xf32>
    %cst_8 = arith.constant 9.99999974E-6 : f32
    %16 = vector.broadcast %cst_8 : f32 to vector<34x1xf32>
    %17 = arith.addf %13, %16 : vector<34x1xf32>
    %18 = math.rsqrt %17 : vector<34x1xf32>
    %19 = vector.broadcast %18 : vector<34x1xf32> to vector<34x64xf32>
    %20 = arith.mulf %15, %19 : vector<34x64xf32>
    %21 = vector.broadcast %1 : vector<1x64xf32> to vector<34x64xf32>
    %22 = arith.mulf %20, %21 : vector<34x64xf32>
    %23 = vector.broadcast %2 : vector<1x64xf32> to vector<34x64xf32>
    %24 = arith.addf %22, %23 : vector<34x64xf32>
    %25 = arith.truncf %24 : vector<34x64xf32> to vector<34x64xbf16>
    %c0_9 = arith.constant 0 : index
    %c0_10 = arith.constant 0 : index
    %26 = vector.load %arg4[%c0_9, %c0_10] : memref<64x192xbf16, #tpu.memory_space<vmem>>, vector<64x192xbf16>
    %cst_11 = arith.constant dense<0.000000e+00> : vector<34x192xf32>
    %27 = tpu.matmul %25, %26, %cst_11 {dimension_numbers = #tpu.dot_dimension_numbers<[1], [0], [0], [1], [0, 0, 1, 1], [], []>} : vector<34x64xbf16>, vector<64x192xbf16>, vector<34x192xf32> -> vector<34x192xf32>
    %c0_12 = arith.constant 0 : index
    %c0_13 = arith.constant 0 : index
    %28 = vector.load %arg5[%c0_12, %c0_13] : memref<1x192xf32, #tpu.memory_space<vmem>>, vector<1x192xf32>
    %29 = vector.broadcast %28 : vector<1x192xf32> to vector<34x192xf32>
    %30 = arith.addf %27, %29 : vector<34x192xf32>
    %31 = arith.truncf %30 : vector<34x192xf32> to vector<34x192xbf16>
    %c0_14 = arith.constant 0 : index
    %c0_15 = arith.constant 0 : index
    %32 = vector.load %arg6[%c0_14, %c0_15] : memref<34x192xbf16, #tpu.memory_space<vmem>>, vector<34x192xbf16>
    tpu.vector_store %arg6[%c0_14, %c0_15], %31 {strides = array<i32>} : memref<34x192xbf16, #tpu.memory_space<vmem>>, vector<34x192xbf16>,
    return
  }
  func.func @transform_0(%arg0: i32) -> (i32, i32) {
    %c0_i32 = arith.constant 0 : i32
    %c0_i32_0 = arith.constant 0 : i32
    return %arg0, %c0_i32 : i32, i32
  }
  func.func @transform_1(%arg0: i32) -> (i32, i32) {
    %c0_i32 = arith.constant 0 : i32
    %c0_i32_0 = arith.constant 0 : i32
    %c0_i32_1 = arith.constant 0 : i32
    return %c0_i32, %c0_i32_0 : i32, i32
  }
  func.func @transform_2(%arg0: i32) -> (i32, i32) {
    %c0_i32 = arith.constant 0 : i32
    %c0_i32_0 = arith.constant 0 : i32
    %c0_i32_1 = arith.constant 0 : i32
    return %c0_i32, %c0_i32_0 : i32, i32
  }
  func.func @transform_3(%arg0: i32) -> (i32, i32) {
    %c0_i32 = arith.constant 0 : i32
    %c0_i32_0 = arith.constant 0 : i32
    %c0_i32_1 = arith.constant 0 : i32
    return %c0_i32, %c0_i32_0 : i32, i32
  }
  func.func @transform_4(%arg0: i32) -> (i32, i32) {
    %c0_i32 = arith.constant 0 : i32
    %c0_i32_0 = arith.constant 0 : i32
    %c0_i32_1 = arith.constant 0 : i32
    return %c0_i32, %c0_i32_0 : i32, i32
  }
  func.func @transform_5(%arg0: i32) -> (i32, i32) {
    %c0_i32 = arith.constant 0 : i32
    %c0_i32_0 = arith.constant 0 : i32
    return %arg0, %c0_i32 : i32, i32
  }
}

module attributes {stable_mosaic.version = 11 : i64} {
  func.func @_attention_kernel(%arg0: i32, %arg1: memref<1x4x17x16xbf16, #tpu.memory_space<vmem>>, %arg2: memref<1x4x17x16xbf16, #tpu.memory_space<vmem>>, %arg3: memref<1x4x17x16xbf16, #tpu.memory_space<vmem>>, %arg4: memref<1x4x17x16xbf16, #tpu.memory_space<vmem>>) attributes {dimension_semantics = [#tpu.dimension_semantics<parallel>], iteration_bounds = array<i64: 2>, scalar_prefetch = 0 : i64, scratch_operands = 0 : i64, tpu.core_type = #tpu.core_type<tc>, window_params = [{transform_indices = @transform_0, window_bounds = array<i64: 1, 4, 17, 16>}, {transform_indices = @transform_1, window_bounds = array<i64: 1, 4, 17, 16>}, {transform_indices = @transform_2, window_bounds = array<i64: 1, 4, 17, 16>}, {transform_indices = @transform_3, window_bounds = array<i64: 1, 4, 17, 16>}]} {
    %c0 = arith.constant 0 : index
    %c0_0 = arith.constant 0 : index
    %c0_1 = arith.constant 0 : index
    %c0_2 = arith.constant 0 : index
    %0 = vector.load %arg1[%c0, %c0_0, %c0_1, %c0_2] : memref<1x4x17x16xbf16, #tpu.memory_space<vmem>>, vector<1x4x17x16xbf16>
    %1 = vector.shape_cast %0 : vector<1x4x17x16xbf16> to vector<4x17x16xbf16>
    %c0_3 = arith.constant 0 : index
    %c0_4 = arith.constant 0 : index
    %c0_5 = arith.constant 0 : index
    %c0_6 = arith.constant 0 : index
    %2 = vector.load %arg2[%c0_3, %c0_4, %c0_5, %c0_6] : memref<1x4x17x16xbf16, #tpu.memory_space<vmem>>, vector<1x4x17x16xbf16>
    %3 = vector.shape_cast %2 : vector<1x4x17x16xbf16> to vector<4x17x16xbf16>
    %c0_7 = arith.constant 0 : index
    %c0_8 = arith.constant 0 : index
    %c0_9 = arith.constant 0 : index
    %c0_10 = arith.constant 0 : index
    %4 = vector.load %arg3[%c0_7, %c0_8, %c0_9, %c0_10] : memref<1x4x17x16xbf16, #tpu.memory_space<vmem>>, vector<1x4x17x16xbf16>
    %5 = vector.shape_cast %4 : vector<1x4x17x16xbf16> to vector<4x17x16xbf16>
    "tpu.trace_start"() <{level = 10 : i32, message = "hnd,hmd->hnm"}> : () -> ()
    %cst = arith.constant dense<0.000000e+00> : vector<4x17x17xf32>
    %6 = tpu.matmul %1, %3, %cst {dimension_numbers = #tpu.dot_dimension_numbers<[2], [2], [1], [1], [0, 0, 0, 1, 1, 1], [0], [0]>} : vector<4x17x16xbf16>, vector<4x17x16xbf16>, vector<4x17x17xf32> -> vector<4x17x17xf32>
    "tpu.trace_stop"() : () -> ()
    %cst_11 = arith.constant 2.500000e-01 : f32
    %7 = vector.broadcast %cst_11 : f32 to vector<4x17x17xf32>
    %8 = arith.mulf %6, %7 : vector<4x17x17xf32>
    %cst_12 = arith.constant dense<0xFF800000> : vector<4x17xf32>
    %9 = vector.multi_reduction <maximumf>, %8, %cst_12 [2] : vector<4x17x17xf32> to vector<4x17xf32>
    %10 = vector.shape_cast %9 : vector<4x17xf32> to vector<4x17x1xf32>
    %11 = vector.broadcast %10 : vector<4x17x1xf32> to vector<4x17x17xf32>
    %12 = arith.subf %8, %11 : vector<4x17x17xf32>
    %13 = math.exp %12 : vector<4x17x17xf32>
    %cst_13 = arith.constant dense<0.000000e+00> : vector<4x17xf32>
    %14 = vector.multi_reduction <add>, %13, %cst_13 [2] : vector<4x17x17xf32> to vector<4x17xf32>
    %15 = vector.shape_cast %14 : vector<4x17xf32> to vector<4x17x1xf32>
    %16 = tpu.reciprocal %15 {approx = true} : vector<4x17x1xf32> -> vector<4x17x1xf32>
    %17 = vector.broadcast %16 : vector<4x17x1xf32> to vector<4x17x17xf32>
    %18 = arith.mulf %13, %17 : vector<4x17x17xf32>
    %19 = arith.truncf %18 : vector<4x17x17xf32> to vector<4x17x17xbf16>
    "tpu.trace_start"() <{level = 10 : i32, message = "hnm,hmd->hnd"}> : () -> ()
    %cst_14 = arith.constant dense<0.000000e+00> : vector<4x17x16xf32>
    %20 = tpu.matmul %19, %5, %cst_14 {dimension_numbers = #tpu.dot_dimension_numbers<[2], [1], [1], [2], [0, 0, 0, 1, 1, 2], [0], [0]>} : vector<4x17x17xbf16>, vector<4x17x16xbf16>, vector<4x17x16xf32> -> vector<4x17x16xf32>
    "tpu.trace_stop"() : () -> ()
    %21 = arith.truncf %20 : vector<4x17x16xf32> to vector<4x17x16xbf16>
    %c0_15 = arith.constant 0 : index
    %c0_16 = arith.constant 0 : index
    %c0_17 = arith.constant 0 : index
    %c0_18 = arith.constant 0 : index
    %22 = vector.load %arg4[%c0_15, %c0_16, %c0_17, %c0_18] : memref<1x4x17x16xbf16, #tpu.memory_space<vmem>>, vector<1x4x17x16xbf16>
    %23 = vector.shape_cast %22 : vector<1x4x17x16xbf16> to vector<4x17x16xbf16>
    %24 = vector.shape_cast %21 : vector<4x17x16xbf16> to vector<1x4x17x16xbf16>
    tpu.vector_store %arg4[%c0_15, %c0_16, %c0_17, %c0_18], %24 {strides = array<i32>} : memref<1x4x17x16xbf16, #tpu.memory_space<vmem>>, vector<1x4x17x16xbf16>,
    return
  }
  func.func @transform_0(%arg0: i32) -> (i32, i32, i32, i32) {
    %c0_i32 = arith.constant 0 : i32
    %c0_i32_0 = arith.constant 0 : i32
    %c0_i32_1 = arith.constant 0 : i32
    %c0_i32_2 = arith.constant 0 : i32
    return %arg0, %c0_i32, %c0_i32_0, %c0_i32_1 : i32, i32, i32, i32
  }
  func.func @transform_1(%arg0: i32) -> (i32, i32, i32, i32) {
    %c0_i32 = arith.constant 0 : i32
    %c0_i32_0 = arith.constant 0 : i32
    %c0_i32_1 = arith.constant 0 : i32
    %c0_i32_2 = arith.constant 0 : i32
    return %arg0, %c0_i32, %c0_i32_0, %c0_i32_1 : i32, i32, i32, i32
  }
  func.func @transform_2(%arg0: i32) -> (i32, i32, i32, i32) {
    %c0_i32 = arith.constant 0 : i32
    %c0_i32_0 = arith.constant 0 : i32
    %c0_i32_1 = arith.constant 0 : i32
    %c0_i32_2 = arith.constant 0 : i32
    return %arg0, %c0_i32, %c0_i32_0, %c0_i32_1 : i32, i32, i32, i32
  }
  func.func @transform_3(%arg0: i32) -> (i32, i32, i32, i32) {
    %c0_i32 = arith.constant 0 : i32
    %c0_i32_0 = arith.constant 0 : i32
    %c0_i32_1 = arith.constant 0 : i32
    %c0_i32_2 = arith.constant 0 : i32
    return %arg0, %c0_i32, %c0_i32_0, %c0_i32_1 : i32, i32, i32, i32
  }
}

module attributes {stable_mosaic.version = 11 : i64} {
  func.func @_ln_matmul_bias_kernel(%arg0: i32, %arg1: memref<2x64xf32, #tpu.memory_space<vmem>>, %arg2: memref<1x64xf32, #tpu.memory_space<vmem>>, %arg3: memref<1x64xf32, #tpu.memory_space<vmem>>, %arg4: memref<64x128xbf16, #tpu.memory_space<vmem>>, %arg5: memref<1x128xf32, #tpu.memory_space<vmem>>, %arg6: memref<2x128xf32, #tpu.memory_space<vmem>>) attributes {dimension_semantics = [#tpu.dimension_semantics<parallel>], iteration_bounds = array<i64: 1>, scalar_prefetch = 0 : i64, scratch_operands = 0 : i64, tpu.core_type = #tpu.core_type<tc>, window_params = [{transform_indices = @transform_0, window_bounds = array<i64: 2, 64>}, {pipeline_mode = #tpu.pipeline_mode<synchronous>, transform_indices = @transform_1, window_bounds = array<i64: 1, 64>}, {pipeline_mode = #tpu.pipeline_mode<synchronous>, transform_indices = @transform_2, window_bounds = array<i64: 1, 64>}, {pipeline_mode = #tpu.pipeline_mode<synchronous>, transform_indices = @transform_3, window_bounds = array<i64: 64, 128>}, {pipeline_mode = #tpu.pipeline_mode<synchronous>, transform_indices = @transform_4, window_bounds = array<i64: 1, 128>}, {transform_indices = @transform_5, window_bounds = array<i64: 2, 128>}]} {
    %c0 = arith.constant 0 : index
    %c0_0 = arith.constant 0 : index
    %0 = vector.load %arg1[%c0, %c0_0] : memref<2x64xf32, #tpu.memory_space<vmem>>, vector<2x64xf32>
    %c0_1 = arith.constant 0 : index
    %c0_2 = arith.constant 0 : index
    %1 = vector.load %arg2[%c0_1, %c0_2] : memref<1x64xf32, #tpu.memory_space<vmem>>, vector<1x64xf32>
    %c0_3 = arith.constant 0 : index
    %c0_4 = arith.constant 0 : index
    %2 = vector.load %arg3[%c0_3, %c0_4] : memref<1x64xf32, #tpu.memory_space<vmem>>, vector<1x64xf32>
    %cst = arith.constant dense<0.000000e+00> : vector<2xf32>
    %3 = vector.multi_reduction <add>, %0, %cst [1] : vector<2x64xf32> to vector<2xf32>
    %4 = vector.shape_cast %3 : vector<2xf32> to vector<2x1xf32>
    %cst_5 = arith.constant 6.400000e+01 : f32
    %5 = vector.broadcast %cst_5 : f32 to vector<2x1xf32>
    %6 = arith.divf %4, %5 : vector<2x1xf32>
    %7 = vector.broadcast %6 : vector<2x1xf32> to vector<2x64xf32>
    %8 = arith.subf %0, %7 : vector<2x64xf32>
    %9 = arith.mulf %8, %8 : vector<2x64xf32>
    %cst_6 = arith.constant dense<0.000000e+00> : vector<2xf32>
    %10 = vector.multi_reduction <add>, %9, %cst_6 [1] : vector<2x64xf32> to vector<2xf32>
    %11 = vector.shape_cast %10 : vector<2xf32> to vector<2x1xf32>
    %cst_7 = arith.constant 6.400000e+01 : f32
    %12 = vector.broadcast %cst_7 : f32 to vector<2x1xf32>
    %13 = arith.divf %11, %12 : vector<2x1xf32>
    %14 = vector.broadcast %6 : vector<2x1xf32> to vector<2x64xf32>
    %15 = arith.subf %0, %14 : vector<2x64xf32>
    %cst_8 = arith.constant 9.99999974E-6 : f32
    %16 = vector.broadcast %cst_8 : f32 to vector<2x1xf32>
    %17 = arith.addf %13, %16 : vector<2x1xf32>
    %18 = math.rsqrt %17 : vector<2x1xf32>
    %19 = vector.broadcast %18 : vector<2x1xf32> to vector<2x64xf32>
    %20 = arith.mulf %15, %19 : vector<2x64xf32>
    %21 = vector.broadcast %1 : vector<1x64xf32> to vector<2x64xf32>
    %22 = arith.mulf %20, %21 : vector<2x64xf32>
    %23 = vector.broadcast %2 : vector<1x64xf32> to vector<2x64xf32>
    %24 = arith.addf %22, %23 : vector<2x64xf32>
    %25 = arith.truncf %24 : vector<2x64xf32> to vector<2x64xbf16>
    %c0_9 = arith.constant 0 : index
    %c0_10 = arith.constant 0 : index
    %26 = vector.load %arg4[%c0_9, %c0_10] : memref<64x128xbf16, #tpu.memory_space<vmem>>, vector<64x128xbf16>
    %cst_11 = arith.constant dense<0.000000e+00> : vector<2x128xf32>
    %27 = tpu.matmul %25, %26, %cst_11 {dimension_numbers = #tpu.dot_dimension_numbers<[1], [0], [0], [1], [0, 0, 1, 1], [], []>} : vector<2x64xbf16>, vector<64x128xbf16>, vector<2x128xf32> -> vector<2x128xf32>
    %c0_12 = arith.constant 0 : index
    %c0_13 = arith.constant 0 : index
    %28 = vector.load %arg5[%c0_12, %c0_13] : memref<1x128xf32, #tpu.memory_space<vmem>>, vector<1x128xf32>
    %29 = vector.broadcast %28 : vector<1x128xf32> to vector<2x128xf32>
    %30 = arith.addf %27, %29 : vector<2x128xf32>
    %c0_14 = arith.constant 0 : index
    %c0_15 = arith.constant 0 : index
    %31 = vector.load %arg6[%c0_14, %c0_15] : memref<2x128xf32, #tpu.memory_space<vmem>>, vector<2x128xf32>
    tpu.vector_store %arg6[%c0_14, %c0_15], %30 {strides = array<i32>} : memref<2x128xf32, #tpu.memory_space<vmem>>, vector<2x128xf32>,
    return
  }
  func.func @transform_0(%arg0: i32) -> (i32, i32) {
    %c0_i32 = arith.constant 0 : i32
    %c0_i32_0 = arith.constant 0 : i32
    return %arg0, %c0_i32 : i32, i32
  }
  func.func @transform_1(%arg0: i32) -> (i32, i32) {
    %c0_i32 = arith.constant 0 : i32
    %c0_i32_0 = arith.constant 0 : i32
    %c0_i32_1 = arith.constant 0 : i32
    return %c0_i32, %c0_i32_0 : i32, i32
  }
  func.func @transform_2(%arg0: i32) -> (i32, i32) {
    %c0_i32 = arith.constant 0 : i32
    %c0_i32_0 = arith.constant 0 : i32
    %c0_i32_1 = arith.constant 0 : i32
    return %c0_i32, %c0_i32_0 : i32, i32
  }
  func.func @transform_3(%arg0: i32) -> (i32, i32) {
    %c0_i32 = arith.constant 0 : i32
    %c0_i32_0 = arith.constant 0 : i32
    %c0_i32_1 = arith.constant 0 : i32
    return %c0_i32, %c0_i32_0 : i32, i32
  }
  func.func @transform_4(%arg0: i32) -> (i32, i32) {
    %c0_i32 = arith.constant 0 : i32
    %c0_i32_0 = arith.constant 0 : i32
    %c0_i32_1 = arith.constant 0 : i32
    return %c0_i32, %c0_i32_0 : i32, i32
  }
  func.func @transform_5(%arg0: i32) -> (i32, i32) {
    %c0_i32 = arith.constant 0 : i32
    %c0_i32_0 = arith.constant 0 : i32
    return %arg0, %c0_i32 : i32, i32
  }
}

module attributes {stable_mosaic.version = 11 : i64} {
  func.func @_proj_mlp_kernel(%arg0: i32, %arg1: memref<34x64xf32, #tpu.memory_space<vmem>>, %arg2: memref<34x64xbf16, #tpu.memory_space<vmem>>, %arg3: memref<64x64xbf16, #tpu.memory_space<vmem>>, %arg4: memref<1x64xf32, #tpu.memory_space<vmem>>, %arg5: memref<1x64xf32, #tpu.memory_space<vmem>>, %arg6: memref<1x64xf32, #tpu.memory_space<vmem>>, %arg7: memref<64x256xbf16, #tpu.memory_space<vmem>>, %arg8: memref<1x256xf32, #tpu.memory_space<vmem>>, %arg9: memref<256x64xbf16, #tpu.memory_space<vmem>>, %arg10: memref<1x64xf32, #tpu.memory_space<vmem>>, %arg11: memref<34x64xf32, #tpu.memory_space<vmem>>) attributes {dimension_semantics = [#tpu.dimension_semantics<parallel>], iteration_bounds = array<i64: 1>, scalar_prefetch = 0 : i64, scratch_operands = 0 : i64, tpu.core_type = #tpu.core_type<tc>, window_params = [{transform_indices = @transform_0, window_bounds = array<i64: 34, 64>}, {transform_indices = @transform_1, window_bounds = array<i64: 34, 64>}, {pipeline_mode = #tpu.pipeline_mode<synchronous>, transform_indices = @transform_2, window_bounds = array<i64: 64, 64>}, {pipeline_mode = #tpu.pipeline_mode<synchronous>, transform_indices = @transform_3, window_bounds = array<i64: 1, 64>}, {pipeline_mode = #tpu.pipeline_mode<synchronous>, transform_indices = @transform_4, window_bounds = array<i64: 1, 64>}, {pipeline_mode = #tpu.pipeline_mode<synchronous>, transform_indices = @transform_5, window_bounds = array<i64: 1, 64>}, {pipeline_mode = #tpu.pipeline_mode<synchronous>, transform_indices = @transform_6, window_bounds = array<i64: 64, 256>}, {pipeline_mode = #tpu.pipeline_mode<synchronous>, transform_indices = @transform_7, window_bounds = array<i64: 1, 256>}, {pipeline_mode = #tpu.pipeline_mode<synchronous>, transform_indices = @transform_8, window_bounds = array<i64: 256, 64>}, {pipeline_mode = #tpu.pipeline_mode<synchronous>, transform_indices = @transform_9, window_bounds = array<i64: 1, 64>}, {transform_indices = @transform_10, window_bounds = array<i64: 34, 64>}]} {
    %c0 = arith.constant 0 : index
    %c0_0 = arith.constant 0 : index
    %0 = vector.load %arg1[%c0, %c0_0] : memref<34x64xf32, #tpu.memory_space<vmem>>, vector<34x64xf32>
    %c0_1 = arith.constant 0 : index
    %c0_2 = arith.constant 0 : index
    %1 = vector.load %arg2[%c0_1, %c0_2] : memref<34x64xbf16, #tpu.memory_space<vmem>>, vector<34x64xbf16>
    %c0_3 = arith.constant 0 : index
    %c0_4 = arith.constant 0 : index
    %2 = vector.load %arg3[%c0_3, %c0_4] : memref<64x64xbf16, #tpu.memory_space<vmem>>, vector<64x64xbf16>
    %cst = arith.constant dense<0.000000e+00> : vector<34x64xf32>
    %3 = tpu.matmul %1, %2, %cst {dimension_numbers = #tpu.dot_dimension_numbers<[1], [0], [0], [1], [0, 0, 1, 1], [], []>} : vector<34x64xbf16>, vector<64x64xbf16>, vector<34x64xf32> -> vector<34x64xf32>
    %c0_5 = arith.constant 0 : index
    %c0_6 = arith.constant 0 : index
    %4 = vector.load %arg4[%c0_5, %c0_6] : memref<1x64xf32, #tpu.memory_space<vmem>>, vector<1x64xf32>
    %5 = vector.broadcast %4 : vector<1x64xf32> to vector<34x64xf32>
    %6 = arith.addf %3, %5 : vector<34x64xf32>
    %7 = arith.addf %0, %6 : vector<34x64xf32>
    %c0_7 = arith.constant 0 : index
    %c0_8 = arith.constant 0 : index
    %8 = vector.load %arg5[%c0_7, %c0_8] : memref<1x64xf32, #tpu.memory_space<vmem>>, vector<1x64xf32>
    %c0_9 = arith.constant 0 : index
    %c0_10 = arith.constant 0 : index
    %9 = vector.load %arg6[%c0_9, %c0_10] : memref<1x64xf32, #tpu.memory_space<vmem>>, vector<1x64xf32>
    %cst_11 = arith.constant dense<0.000000e+00> : vector<34xf32>
    %10 = vector.multi_reduction <add>, %7, %cst_11 [1] : vector<34x64xf32> to vector<34xf32>
    %11 = vector.shape_cast %10 : vector<34xf32> to vector<34x1xf32>
    %cst_12 = arith.constant 6.400000e+01 : f32
    %12 = vector.broadcast %cst_12 : f32 to vector<34x1xf32>
    %13 = arith.divf %11, %12 : vector<34x1xf32>
    %14 = vector.broadcast %13 : vector<34x1xf32> to vector<34x64xf32>
    %15 = arith.subf %7, %14 : vector<34x64xf32>
    %16 = arith.mulf %15, %15 : vector<34x64xf32>
    %cst_13 = arith.constant dense<0.000000e+00> : vector<34xf32>
    %17 = vector.multi_reduction <add>, %16, %cst_13 [1] : vector<34x64xf32> to vector<34xf32>
    %18 = vector.shape_cast %17 : vector<34xf32> to vector<34x1xf32>
    %cst_14 = arith.constant 6.400000e+01 : f32
    %19 = vector.broadcast %cst_14 : f32 to vector<34x1xf32>
    %20 = arith.divf %18, %19 : vector<34x1xf32>
    %21 = vector.broadcast %13 : vector<34x1xf32> to vector<34x64xf32>
    %22 = arith.subf %7, %21 : vector<34x64xf32>
    %cst_15 = arith.constant 9.99999974E-6 : f32
    %23 = vector.broadcast %cst_15 : f32 to vector<34x1xf32>
    %24 = arith.addf %20, %23 : vector<34x1xf32>
    %25 = math.rsqrt %24 : vector<34x1xf32>
    %26 = vector.broadcast %25 : vector<34x1xf32> to vector<34x64xf32>
    %27 = arith.mulf %22, %26 : vector<34x64xf32>
    %28 = vector.broadcast %8 : vector<1x64xf32> to vector<34x64xf32>
    %29 = arith.mulf %27, %28 : vector<34x64xf32>
    %30 = vector.broadcast %9 : vector<1x64xf32> to vector<34x64xf32>
    %31 = arith.addf %29, %30 : vector<34x64xf32>
    %32 = arith.truncf %31 : vector<34x64xf32> to vector<34x64xbf16>
    %c0_16 = arith.constant 0 : index
    %c0_17 = arith.constant 0 : index
    %33 = vector.load %arg7[%c0_16, %c0_17] : memref<64x256xbf16, #tpu.memory_space<vmem>>, vector<64x256xbf16>
    %cst_18 = arith.constant dense<0.000000e+00> : vector<34x256xf32>
    %34 = tpu.matmul %32, %33, %cst_18 {dimension_numbers = #tpu.dot_dimension_numbers<[1], [0], [0], [1], [0, 0, 1, 1], [], []>} : vector<34x64xbf16>, vector<64x256xbf16>, vector<34x256xf32> -> vector<34x256xf32>
    %c0_19 = arith.constant 0 : index
    %c0_20 = arith.constant 0 : index
    %35 = vector.load %arg8[%c0_19, %c0_20] : memref<1x256xf32, #tpu.memory_space<vmem>>, vector<1x256xf32>
    %36 = vector.broadcast %35 : vector<1x256xf32> to vector<34x256xf32>
    %37 = arith.addf %34, %36 : vector<34x256xf32>
    %cst_21 = arith.constant 5.000000e-01 : f32
    %38 = vector.broadcast %cst_21 : f32 to vector<34x256xf32>
    %39 = arith.mulf %38, %37 : vector<34x256xf32>
    %cst_22 = arith.constant 1.41421354 : f32
    %40 = vector.broadcast %cst_22 : f32 to vector<34x256xf32>
    %41 = arith.divf %37, %40 : vector<34x256xf32>
    %42 = math.erf %41 : vector<34x256xf32>
    %cst_23 = arith.constant 1.000000e+00 : f32
    %43 = vector.broadcast %cst_23 : f32 to vector<34x256xf32>
    %44 = arith.addf %43, %42 : vector<34x256xf32>
    %45 = arith.mulf %39, %44 : vector<34x256xf32>
    %46 = arith.truncf %45 : vector<34x256xf32> to vector<34x256xbf16>
    %c0_24 = arith.constant 0 : index
    %c0_25 = arith.constant 0 : index
    %47 = vector.load %arg9[%c0_24, %c0_25] : memref<256x64xbf16, #tpu.memory_space<vmem>>, vector<256x64xbf16>
    %cst_26 = arith.constant dense<0.000000e+00> : vector<34x64xf32>
    %48 = tpu.matmul %46, %47, %cst_26 {dimension_numbers = #tpu.dot_dimension_numbers<[1], [0], [0], [1], [0, 0, 1, 1], [], []>} : vector<34x256xbf16>, vector<256x64xbf16>, vector<34x64xf32> -> vector<34x64xf32>
    %c0_27 = arith.constant 0 : index
    %c0_28 = arith.constant 0 : index
    %49 = vector.load %arg10[%c0_27, %c0_28] : memref<1x64xf32, #tpu.memory_space<vmem>>, vector<1x64xf32>
    %50 = vector.broadcast %49 : vector<1x64xf32> to vector<34x64xf32>
    %51 = arith.addf %48, %50 : vector<34x64xf32>
    %52 = arith.addf %7, %51 : vector<34x64xf32>
    %c0_29 = arith.constant 0 : index
    %c0_30 = arith.constant 0 : index
    %53 = vector.load %arg11[%c0_29, %c0_30] : memref<34x64xf32, #tpu.memory_space<vmem>>, vector<34x64xf32>
    tpu.vector_store %arg11[%c0_29, %c0_30], %52 {strides = array<i32>} : memref<34x64xf32, #tpu.memory_space<vmem>>, vector<34x64xf32>,
    return
  }
  func.func @transform_0(%arg0: i32) -> (i32, i32) {
    %c0_i32 = arith.constant 0 : i32
    %c0_i32_0 = arith.constant 0 : i32
    return %arg0, %c0_i32 : i32, i32
  }
  func.func @transform_1(%arg0: i32) -> (i32, i32) {
    %c0_i32 = arith.constant 0 : i32
    %c0_i32_0 = arith.constant 0 : i32
    return %arg0, %c0_i32 : i32, i32
  }
  func.func @transform_2(%arg0: i32) -> (i32, i32) {
    %c0_i32 = arith.constant 0 : i32
    %c0_i32_0 = arith.constant 0 : i32
    %c0_i32_1 = arith.constant 0 : i32
    return %c0_i32, %c0_i32_0 : i32, i32
  }
  func.func @transform_3(%arg0: i32) -> (i32, i32) {
    %c0_i32 = arith.constant 0 : i32
    %c0_i32_0 = arith.constant 0 : i32
    %c0_i32_1 = arith.constant 0 : i32
    return %c0_i32, %c0_i32_0 : i32, i32
  }
  func.func @transform_4(%arg0: i32) -> (i32, i32) {
    %c0_i32 = arith.constant 0 : i32
    %c0_i32_0 = arith.constant 0 : i32
    %c0_i32_1 = arith.constant 0 : i32
    return %c0_i32, %c0_i32_0 : i32, i32
  }
  func.func @transform_5(%arg0: i32) -> (i32, i32) {
    %c0_i32 = arith.constant 0 : i32
    %c0_i32_0 = arith.constant 0 : i32
    %c0_i32_1 = arith.constant 0 : i32
    return %c0_i32, %c0_i32_0 : i32, i32
  }
  func.func @transform_6(%arg0: i32) -> (i32, i32) {
    %c0_i32 = arith.constant 0 : i32
    %c0_i32_0 = arith.constant 0 : i32
    %c0_i32_1 = arith.constant 0 : i32
    return %c0_i32, %c0_i32_0 : i32, i32
  }
  func.func @transform_7(%arg0: i32) -> (i32, i32) {
    %c0_i32 = arith.constant 0 : i32
    %c0_i32_0 = arith.constant 0 : i32
    %c0_i32_1 = arith.constant 0 : i32
    return %c0_i32, %c0_i32_0 : i32, i32
  }
  func.func @transform_8(%arg0: i32) -> (i32, i32) {
    %c0_i32 = arith.constant 0 : i32
    %c0_i32_0 = arith.constant 0 : i32
    %c0_i32_1 = arith.constant 0 : i32
    return %c0_i32, %c0_i32_0 : i32, i32
  }
  func.func @transform_9(%arg0: i32) -> (i32, i32) {
    %c0_i32 = arith.constant 0 : i32
    %c0_i32_0 = arith.constant 0 : i32
    %c0_i32_1 = arith.constant 0 : i32
    return %c0_i32, %c0_i32_0 : i32, i32
  }
  func.func @transform_10(%arg0: i32) -> (i32, i32) {
    %c0_i32 = arith.constant 0 : i32
    %c0_i32_0 = arith.constant 0 : i32
    return %arg0, %c0_i32 : i32, i32
  }
}

</mosaic_0001>

<bundles_post_ra>
// kernel: vit_forward.8
= control target key start
LH: loop header
LB: loop body
LE: loop exit
PB: predicated region body
PF: predicated region fallthrough
CT: control target
= control target key end

     0   :  { %vm52_vm0 = vcmask 392192   ;;  %vm108_vm1 = vcmask 523264   ;;  %s197_s1 = inlined_call_operand.vmem [shape: bf16[48,64], index: 1, kind: input, shape index: {}]   ;;  %s198_s0 = inlined_call_operand.vmem [shape: f32[32,48], index: 0, kind: input, shape index: {}]   ;;  %s199_s2 = inlined_call_operand.vmem [shape: f32[1,64], index: 2, kind: input, shape index: {}]   ;;  %s200_s3 = inlined_call_operand.vmem [shape: f32[32,64], index: 3, kind: output, shape index: {}]  }
   0x1   :  { %v138_v0 = vld [vmem:[%s197_s1 + $0x10] sm:$0xff]   ;;  %v139_v1 = vld [vmem:[%s197_s1 + $0x8] sm:$0xff]   ;;  %v15_v2 = vld [vmem:[%s198_s0] sm:$0xff] }
   0x2   :  { %128 = vmatprep.subr.bf16.mxu0 %v138_v0  ;;  %v16_v3 = vld [vmem:[%s198_s0 + $0x8] sm:$0xff]  ;;  %v140_v4 = vld [vmem:[%s197_s1] sm:$0xff]   ;;  %v17_v6 = vld [vmem:[%s198_s0 + $0x10] sm:$0xff] }
   0x3   :  { %129 = vmatpush3.bf16.msra.mxu0 %v138_v0  ;;  %v19_v5 = vpack.c.bf16 %v16_v3, %v15_v2  ;;  %v18_v7 = vld [vmem:[%s198_s0 + $0x18] sm:$0xff]  ;;  %v117_v9 = vld [vmem:[%s199_s2] ss:$0 sm:$0xff] }
   0x4   :  { %130 = vmatprep.subr.bf16.mxu0 %v139_v1  ;;  %v20_v8 = vpack.c.bf16 %v18_v7, %v17_v6 }
   0x5   :  { %134 = vmatprep.mubr.msk.bf16.mxu0 %vm52_vm0, %v19_v5 }
   0x7   :  { %131 = vmatpush3.bf16.msra.mxu0 %v139_v1 }
   0x8   :  { %132 = vmatprep.subr.bf16.mxu0 %v140_v4 }
   0xb   :  { %133 = vmatpush3.bf16.msra.mxu0 %v140_v4 }
   0xe   :  { %135 = vmatmul.mubr.msk.bf16.vlgmr.msra.gmra.mxu0 %vm52_vm0, %v20_v8 }
  0xce   :  { %v136_v10 = vpop.f32.mrf.mxu0 }
  0xcf   :  { %v102_v11 = vadd.f32 %v136_v10, %v117_v9 }
  0xd0   :  { %v93_v12 = vpop.f32.mrf.mxu0 }
  0xd1   :  { %111 = vst.msk [vmem:[%s200_s3 + $0x10] sm:$0xff] %vm108_vm1, %v102_v11  ;;  %v94_v13 = vadd.f32 %v117_v9, %v93_v12 }
  0xd2   :  { %v137_v14 = vpop.f32.mrf.mxu0 }
  0xd3   :  { %109 = vst.msk [vmem:[%s200_s3] sm:$0xff] %vm108_vm1, %v94_v13  ;;  %v105_v15 = vadd.f32 %v137_v14, %v117_v9 }
  0xd4   :  { %v96_v16 = vpop.f32.mrf.mxu0 }
  0xd5   :  { %112 = vst.msk [vmem:[%s200_s3 + $0x18] sm:$0xff] %vm108_vm1, %v105_v15  ;;  %v97_v17 = vadd.f32 %v117_v9, %v96_v16 }
  0xd7   :  { %110 = vst.msk [vmem:[%s200_s3 + $0x8] sm:$0xff] %vm108_vm1, %v97_v17 }

// kernel: vit_forward.9
= control target key start
LH: loop header
LB: loop body
LE: loop exit
PB: predicated region body
PF: predicated region fallthrough
CT: control target
= control target key end

     0   :  { %vm28_vm0 = vcmask 523264   ;;  %vm41_vm1 = vcmask 517120   ;;  %v352_v37 = vmov 0   ;;  %vm283_vm2 = vcmask 1043456   ;;  %s499_s0 = inlined_call_operand.vmem [shape: f32[34,64], index: 0, kind: input, shape index: {}]   ;;  %s500_s3 = inlined_call_operand.vmem [shape: bf16[64,192], index: 3, kind: input, shape index: {}]   ;;  %s501_s1 = inlined_call_operand.vmem [shape: f32[1,64], index: 1, kind: input, shape index: {}]   ;;  %s502_s2 = inlined_call_operand.vmem [shape: f32[1,64], index: 2, kind: input, shape index: {}]   ;;  %s503_s4 = inlined_call_operand.vmem [shape: f32[1,192], index: 4, kind: input, shape index: {}]   ;;  %s504_s5 = inlined_call_operand.vmem [shape: bf16[34,192], index: 5, kind: output, shape index: {}]  }
   0x1   :  { %v23_v0 = vld [vmem:[%s499_s0 + $0x10] sm:$0xff]  ;;  %v24_v1 = vld [vmem:[%s499_s0 + $0x18] sm:$0xff]  ;;  %v21_v2 = vld [vmem:[%s499_s0] sm:$0xff]  ;;  %232 = vmatprep.mubr.bf16.mxu1 %v352_v37  ;;  %222 = vmatprep.mubr.bf16.mxu0 %v352_v37  ;;  %vm284_vm3 = vcmask 523268   ;;  %vm290_vm5 = vcmask 1040384   ;;  %vm291_vm6 = vcmask 520196  }
   0x2   :  { %v35_v3 = vsel %vm28_vm0, %v23_v0, 0.0  ;;  %v29_v4 = vsel %vm28_vm0, %v21_v2, 0.0  ;;  %v22_v5 = vld [vmem:[%s499_s0 + $0x8] sm:$0xff]  ;;  %v38_v6 = vsel %vm28_vm0, %v24_v1, 0.0  ;;  %v25_v8 = vld [vmem:[%s499_s0 + $0x20] sm:$0x3]  ;;  %vm472_vm4 = vmor %vm284_vm3, %vm283_vm2 }
   0x3   :  { %36 = vadd.xlane.f32.xlu0 %v35_v3  ;;  %30 = vadd.xlane.f32.xlu1 %v29_v4  ;;  %v32_v7 = vsel %vm28_vm0, %v22_v5, 0.0  ;;  %v42_v9 = vsel %vm41_vm1, %v25_v8, 0.0  ;;  %v330_v35 = vld [vmem:[%s500_s3 + $0x34] ss:$8 sps:$4 sm:$0xff]   ;;  %v332_v36 = vld [vmem:[%s500_s3 + $0x30] ss:$8 sps:$4 sm:$0xff]   ;;  %vm292_vm7 = vmor %vm291_vm6, %vm290_vm5 }
   0x4   :  { %321 = vmatprep.subr.bf16.mxu1 %v330_v35  ;;  %198 = vmatprep.subr.bf16.mxu0 %v330_v35  ;;  %v333_v38 = vld [vmem:[%s500_s3 + $0x24] ss:$8 sps:$4 sm:$0xff]   ;;  %v335_v39 = vld [vmem:[%s500_s3 + $0x20] ss:$8 sps:$4 sm:$0xff]   ;;  %v336_v40 = vld [vmem:[%s500_s3 + $0x14] ss:$8 sps:$4 sm:$0xff]  }
   0x5   :  { %325 = vmatpush1.bf16.msra.mxu1 %v332_v36  ;;  %199 = vmatpush1.bf16.msra.mxu0 %v332_v36  ;;  %v338_v41 = vld [vmem:[%s500_s3 + $0x10] ss:$8 sps:$4 sm:$0xff]   ;;  %v339_v42 = vld [vmem:[%s500_s3 + $0x4] ss:$8 sps:$4 sm:$0xff]   ;;  %v341_v43 = vld [vmem:[%s500_s3] ss:$8 sps:$4 sm:$0xff]  }
   0x6   :  { %322 = vmatprep.subr.bf16.mxu1 %v333_v38  ;;  %200 = vmatprep.subr.bf16.mxu0 %v333_v38  ;;  %v298_v61 = vld [vmem:[%s501_s1] ss:$0 sm:$0xff] }
   0x7   :  { %39 = vadd.xlane.f32.xlu0 %v38_v6  ;;  %33 = vadd.xlane.f32.xlu1 %v32_v7 }
   0x9   :  { %326 = vmatpush1.bf16.msra.mxu1 %v335_v39  ;;  %201 = vmatpush1.bf16.msra.mxu0 %v335_v39 }
   0xa   :  { %323 = vmatprep.subr.bf16.mxu1 %v336_v40  ;;  %202 = vmatprep.subr.bf16.mxu0 %v336_v40 }
   0xb   :  { %43 = vadd.xlane.f32.xlu0 %v42_v9 }
   0xd   :  { %327 = vmatpush1.bf16.msra.mxu1 %v338_v41  ;;  %203 = vmatpush1.bf16.msra.mxu0 %v338_v41 }
   0xe   :  { %324 = vmatprep.subr.bf16.mxu1 %v339_v42  ;;  %204 = vmatprep.subr.bf16.mxu0 %v339_v42 }
  0x11   :  { %328 = vmatpush1.bf16.msra.mxu1 %v341_v43  ;;  %205 = vmatpush1.bf16.msra.mxu0 %v341_v43 }
  0x8c   :  { %v37_v10 = vpop.xlane.xlu0 %36  ;;  %v31_v11 = vpop.xlane.xlu1 %30 }
  0x8d   :  { %v48_v12 = vmul.f32 0.015625, %v37_v10  ;;  %v46_v13 = vmul.f32 0.015625, %v31_v11 }
  0x8f   :  { %v403_v14 = vsub.f32 %v23_v0, %v48_v12  ;;  %v405_v15 = vsub.f32 %v21_v2, %v46_v13  ;;  %v299_v2 = vld [vmem:[%s502_s2] ss:$0 sm:$0xff] }
  0x90   :  { %v40_v16 = vpop.xlane.xlu0 %39  ;;  %v34_v17 = vpop.xlane.xlu1 %33 }
  0x91   :  { %v49_v18 = vmul.f32 0.015625, %v40_v16  ;;  %v58_v19 = vmul.f32 %v403_v14, %v403_v14  ;;  %v47_v20 = vmul.f32 0.015625, %v34_v17  ;;  %v56_v21 = vmul.f32 %v405_v15, %v405_v15 }
  0x93   :  { %v411_v22 = vsub.f32 %v24_v1, %v49_v18  ;;  %v67_v23 = vsel %vm28_vm0, %v58_v19, 0.0  ;;  %v414_v24 = vsub.f32 %v22_v5, %v47_v20  ;;  %v61_v28 = vsel %vm28_vm0, %v56_v21, 0.0 }
  0x94   :  { %v44_v25 = vpop.xlane.xlu0 %43  ;;  %68 = vadd.xlane.f32.xlu1 %v67_v23  ;;  %v131_v20 = vlaneseq }
  0x95   :  { %v50_v26 = vmul.f32 0.015625, %v44_v25  ;;  %v59_v27 = vmul.f32 %v411_v22, %v411_v22  ;;  %v57_v29 = vmul.f32 %v414_v24, %v414_v24 }
  0x96   :  { %v132_v21 = vshrl.u32 %v131_v20, 7 }
  0x97   :  { %v421_v30 = vsub.f32 %v25_v8, %v50_v26  ;;  %v70_v31 = vsel %vm28_vm0, %v59_v27, 0.0  ;;  %v64_v33 = vsel %vm28_vm0, %v57_v29, 0.0 }
  0x98   :  { %71 = vadd.xlane.f32.xlu0 %v70_v31  ;;  %62 = vadd.xlane.f32.xlu1 %v61_v28  ;;  %v137_v23 = vsub.s32 1, %v132_v21 }
  0x99   :  { %v60_v32 = vmul.f32 %v421_v30, %v421_v30 }
  0x9b   :  { %v73_v34 = vsel %vm41_vm1, %v60_v32, 0.0 }
  0x9c   :  { %74 = vadd.xlane.f32.xlu1 %v73_v34  ;;  %65 = vadd.xlane.f32.xlu0 %v64_v33 }
 0x11d   :  { %v69_v44 = vpop.xlane.xlu1 %68 }
 0x11e   :  { %v78_v45 = vmul.f32 0.015625, %v69_v44 }
 0x120   :  { %v83_v46 = vadd.f32 1e-05, %v78_v45 }
 0x121   :  { %v72_v47 = vpop.xlane.xlu0 %71  ;;  %v63_v48 = vpop.xlane.xlu1 %62 }
 0x122   :  { %342 = vrsqrt.f32 %v83_v46  ;;  %v79_v49 = vmul.f32 0.015625, %v72_v47  ;;  %v76_v50 = vmul.f32 0.015625, %v63_v48 }
 0x124   :  { %v84_v51 = vadd.f32 1e-05, %v79_v49  ;;  %v81_v52 = vadd.f32 1e-05, %v76_v50 }
 0x125   :  { %v66_v53 = vpop.xlane.xlu0 %65  ;;  %v75_v54 = vpop.xlane.xlu1 %74 }
 0x126   :  { %344 = vrsqrt.f32 %v84_v51  ;;  %v77_v55 = vmul.f32 0.015625, %v66_v53  ;;  %v80_v56 = vmul.f32 0.015625, %v75_v54 }
 0x127   :  { %346 = vrsqrt.f32 %v81_v52 }
 0x128   :  { %v82_v57 = vadd.f32 1e-05, %v77_v55  ;;  %v85_v58 = vadd.f32 1e-05, %v80_v56 }
 0x12a   :  { %348 = vrsqrt.f32 %v82_v57 }
 0x12b   :  { %350 = vrsqrt.f32 %v85_v58 }
 0x12f   :  { %v343_v59 = vpop.eup %342 }
 0x130   :  { %v93_v60 = vmul.f32 %v343_v59, %v403_v14 }
 0x132   :  { %v104_v1 = vmul.f32 %v298_v61, %v93_v60 }
 0x133   :  { %v345_v62 = vpop.eup %344 }
 0x134   :  { %v347_v63 = vpop.eup %346  ;;  %v94_v0 = vmul.f32 %v345_v62, %v411_v22  ;;  %v115_v7 = vadd.f32 %v299_v2, %v104_v1  ;;  %v133_v22 = vsub.s32 0, %v132_v21 }
 0x135   :  { %v91_v3 = vmul.f32 %v347_v63, %v405_v15 }
 0x136   :  { %v105_v4 = vmul.f32 %v298_v61, %v94_v0 }
 0x137   :  { %v349_v5 = vpop.eup %348  ;;  %v102_v10 = vmul.f32 %v298_v61, %v91_v3 }
 0x138   :  { %v351_v6 = vpop.eup %350  ;;  %v116_v8 = vadd.f32 %v299_v2, %v105_v4  ;;  %v92_v9 = vmul.f32 %v349_v5, %v414_v24  ;;  %v129_v24 = vld [vmem:[%s503_s4] sm:$0x3] }
 0x139   :  { %v95_v11 = vmul.f32 %v351_v6, %v421_v30  ;;  %v113_v16 = vadd.f32 %v299_v2, %v102_v10  ;;  %v134_v25 = vrot.slane %v129_v24, %v133_v22  ;;  %v138_v26 = vrot.slane %v129_v24, %v137_v23 }
 0x13a   :  { %v119_v12 = vpack.c.bf16 %v116_v8, %v115_v7  ;;  %v103_v13 = vmul.f32 %v298_v61, %v92_v9 }
 0x13b   :  { %v106_v14 = vmul.f32 %v298_v61, %v95_v11 }
 0x13c   :  { %309 = vmatmul.mubr.msk.bf16.vlgmr.msra.gmra.mxu1 %vm28_vm0, %v119_v12  ;;  %v114_v17 = vadd.f32 %v299_v2, %v103_v13 }
 0x13d   :  { %242 = vmatprep.mubr.bf16.mxu1 %v352_v37  ;;  %v117_v18 = vadd.f32 %v299_v2, %v106_v14 }
 0x13e   :  { %v118_v15 = vpack.c.bf16 %v114_v17, %v113_v16 }
 0x13f   :  { %v120_v19 = vpack.c.bf16 %v117_v18, %v117_v18 }
 0x140   :  { %308 = vmatmul.mubr.msk.bf16.vlgmr.msra.gmra.mxu0 %vm28_vm0, %v118_v15 }
 0x144   :  { %310 = vmatmul.mubr.msk.bf16.gmra.mxu1 %vm28_vm0, %v120_v19 }
 0x1fc   :  { %v234_v27 = vpop.f32.mrf.mxu1 }
 0x1fd   :  { %v235_v29 = vadd.f32 %v234_v27, %v134_v25 }
 0x1fe   :  { %v236_v28 = vpop.f32.mrf.mxu1 }
 0x1ff   :  { %v237_v30 = vadd.f32 %v236_v28, %v138_v26 }
 0x200   :  { %v224_v32 = vpop.f32.mrf.mxu0  ;;  %v238_v33 = vpop.f32.mrf.mxu1 }
 0x201   :  { %v318_v34 = vpack.c.bf16 %v237_v30, %v235_v29  ;;  %v225_v37 = vadd.f32 %v224_v32, %v134_v25  ;;  %v239_v38 = vadd.f32 %v238_v33, %v134_v25 }
 0x202   :  { %v226_v35 = vpop.f32.mrf.mxu0  ;;  %v240_v36 = vpop.f32.mrf.mxu1 }
 0x203   :  { %288 = vst.msk [vmem:[%s504_s5 + $0x10] sm:$0xff] %vm472_vm4, %v318_v34  ;;  %v227_v39 = vadd.f32 %v226_v35, %v138_v26  ;;  %v241_v40 = vadd.f32 %v240_v36, %v138_v26 }
 0x204   :  { %v228_v41 = vpop.f32.mrf.mxu0  ;;  %v244_v42 = vpop.f32.mrf.mxu1 }
 0x205   :  { %v316_v43 = vpack.c.bf16 %v227_v39, %v225_v37  ;;  %v319_v44 = vpack.c.bf16 %v241_v40, %v239_v38  ;;  %v229_v47 = vadd.f32 %v228_v41, %v134_v25  ;;  %v245_v48 = vadd.f32 %v244_v42, %v134_v25 }
 0x206   :  { %v230_v45 = vpop.f32.mrf.mxu0  ;;  %v246_v46 = vpop.f32.mrf.mxu1 }
 0x207   :  { %286 = vst.msk [vmem:[%s504_s5] sm:$0xff] %vm472_vm4, %v316_v43  ;;  %289 = vst.msk [vmem:[%s504_s5 + $0x18] sm:$0xff] %vm472_vm4, %v319_v44  ;;  %v231_v49 = vadd.f32 %v230_v45, %v138_v26  ;;  %v247_v50 = vadd.f32 %v246_v46, %v138_v26 }
 0x208   :  { %v248_v51 = vpop.f32.mrf.mxu1 }
 0x209   :  { %v317_v52 = vpack.c.bf16 %v231_v49, %v229_v47  ;;  %v320_v53 = vpack.c.bf16 %v247_v50, %v245_v48 }
 0x20a   :  { %v249_v54 = vpop.f32.mrf.mxu1 }
 0x20b   :  { %287 = vst.msk [vmem:[%s504_s5 + $0x8] sm:$0xff] %vm472_vm4, %v317_v52 }
 0x20c   :  { %293 = vst.msk [vmem:[%s504_s5 + $0x20] sm:$0x11] %vm292_vm7, %v320_v53 }

// kernel: vit_forward.15
= control target key start
LH: loop header
LB: loop body
LE: loop exit
PB: predicated region body
PF: predicated region fallthrough
CT: control target
= control target key end

     0   :  { %vm25_vm0 = vcmask 517120   ;;  %s269_s0 = inlined_call_operand.vmem [shape: f32[2,64], index: 0, kind: input, shape index: {}]   ;;  %s270_s1 = inlined_call_operand.vmem [shape: f32[1,64], index: 1, kind: input, shape index: {}]   ;;  %s271_s2 = inlined_call_operand.vmem [shape: f32[1,64], index: 2, kind: input, shape index: {}]   ;;  %s272_s3 = inlined_call_operand.vmem [shape: bf16[64,128], index: 3, kind: input, shape index: {}]   ;;  %s273_s4 = inlined_call_operand.vmem [shape: f32[1,128], index: 4, kind: input, shape index: {}]   ;;  %s274_s5 = inlined_call_operand.hbm [shape: f32[2,128], index: 5, kind: output, shape index: {}]  }
   0x1   :  { %v22_v0 = vld [vmem:[%s269_s0] sm:$0x3] }
   0x2   :  { %v26_v1 = vsel %vm25_vm0, %v22_v0, 0.0 }
   0x3   :  { %27 = vadd.xlane.f32.xlu0 %v26_v1 }
   0x4   :  { %10 = vsyncpa [#allocation3], 0  ;;  %v181_v7 = vld [vmem:[%s272_s3 + $0x18] sm:$0xff]   ;;  %v209_v8 = vmov 0.0   ;;  %vm210_vm1 = vmmov 0   ;;  %v182_v9 = vld [vmem:[%s272_s3 + $0x10] sm:$0xff]  }
   0x5   :  { %166 = vmatprep.subr.bf16.mxu0 %v209_v8  ;;  %174 = vmatprep.mubr.msk.bf16.mxu0 %vm210_vm1, %v209_v8  ;;  %v183_v10 = vld [vmem:[%s272_s3 + $0x8] sm:$0xff]   ;;  %v184_v11 = vld [vmem:[%s272_s3] sm:$0xff]   ;;  %vm94_vm2 = vcmask 523264   ;;  %s211_s7 = smov [#allocation2]  }
   0x6   :  { %167 = vmatpush3.bf16.msra.mxu0 %v181_v7  ;;  %v153_v16 = vld [vmem:[%s270_s1] ss:$0 sm:$0xff]  ;;  %s145_s8 = sshll.u32 %s211_s7, 4  ;;  %s146_s8 = int_to_ptr.vmem [resolvable:$true] %s145_s8 }
   0x7   :  { %168 = vmatprep.subr.bf16.mxu0 %v209_v8  ;;  %v154_v18 = vld [vmem:[%s271_s2] ss:$0 sm:$0xff]  ;;  %s187_s1 = scalar_lea.vmem %s146_s8, 32  ;;  %p192_p1 = scmp.lt.s32.totalorder %s146_s8, %s146_s8 }
   0x8   :  { %v155_v22 = vld [vmem:[%s273_s4] ss:$0 sm:$0xff]  ;;  %p188_p0 = scmp.ne.s32.totalorder %s146_s8, %s187_s1  ;;  %p193_p2 = scmp.lt.s32.totalorder %s187_s1, %s187_s1 }
   0xa   :  { %169 = vmatpush3.bf16.msra.mxu0 %v182_v9  ;;  %p194_p3 = por %p193_p2, %p192_p1 }
   0xb   :  { %170 = vmatprep.subr.bf16.mxu0 %v209_v8 }
   0xc   :  { %p195_p4 = pnand %p194_p3, %p188_p0 }
   0xe   :  { %171 = vmatpush3.bf16.msra.mxu0 %v183_v10 }
   0xf   :  { %172 = vmatprep.subr.bf16.mxu0 %v209_v8 }
  0x12   :  { %173 = vmatpush3.bf16.msra.mxu0 %v184_v11 }
  0x8c   :  { %v28_v2 = vpop.xlane.xlu0 %27 }
  0x8d   :  { %v30_v3 = vmul.f32 0.015625, %v28_v2 }
  0x8f   :  { %v31_v4 = vsub.f32 %v22_v0, %v30_v3 }
  0x91   :  { %v32_v5 = vmul.f32 %v31_v4, %v31_v4 }
  0x93   :  { %v33_v6 = vsel %vm25_vm0, %v32_v5, 0.0 }
  0x94   :  { %34 = vadd.xlane.f32.xlu0 %v33_v6 }
 0x11d   :  { %v35_v12 = vpop.xlane.xlu0 %34 }
 0x11e   :  { %v36_v13 = vmul.f32 0.015625, %v35_v12 }
 0x120   :  { %v37_v14 = vadd.f32 1e-05, %v36_v13 }
 0x122   :  { %185 = vrsqrt.f32 %v37_v14 }
 0x12f   :  { %v186_v15 = vpop.eup %185 }
 0x130   :  { %v39_v17 = vmul.f32 %v186_v15, %v31_v4 }
 0x132   :  { %v46_v19 = vmul.f32 %v153_v16, %v39_v17 }
 0x134   :  { %v53_v20 = vadd.f32 %v154_v18, %v46_v19 }
 0x136   :  { %v54_v21 = vpack.c.bf16 %v53_v20, %v53_v20 }
 0x138   :  { %175 = vmatmul.mubr.msk.bf16.vlgmr.msra.gmra.mxu0 %vm94_vm2, %v54_v21 }
 0x1f8   :  { %v132_v23 = vpop.f32.mrf.mxu0 }
 0x1f9   :  { %v133_v24 = vadd.f32 %v155_v22, %v132_v23 }
 0x1fa   :  { %v176_v25 = vpop.f32.mrf.mxu0 }
 0x1fb   :  { %138 = vst [vmem:[#allocation2] sm:$0x3] %v133_v24 }
 0x1fc   :  { %v135_v26 = vpop.f32.mrf.mxu0 }
 0x1fd   :  { %198 = shalt.err (!%p195_p4)
}
 0x1fe   :  { %148 = dma.vmem_to_hbm [thread:$0]  %s146_s8, 32, %s274_s5, [#allocation3]   ;;  %v177_v27 = vpop.f32.mrf.mxu0 }
 0x1ff   :  { %207 = dma.done.wait [#allocation3], 32  }
 0x200   :  { %208 = vsyncadd [#allocation3], 4294967264 }
 0x201   :  { %152 = vsyncpa [#allocation3], 1 }

// kernel: vit_forward.10
= control target key start
LH: loop header
LB: loop body
LE: loop exit
PB: predicated region body
PF: predicated region fallthrough
CT: control target
= control target key end

     0   :  { %s1419_s12 = smov 0   ;;  %s1632_s0 = inlined_call_operand.vmem [shape: bf16[2,4,17,16], index: 0, kind: input, shape index: {}]   ;;  %s1633_s1 = inlined_call_operand.vmem [shape: bf16[2,4,17,16], index: 1, kind: input, shape index: {}]   ;;  %s1634_s2 = inlined_call_operand.vmem [shape: bf16[2,4,17,16], index: 2, kind: input, shape index: {}]   ;;  %s1635_s3 = inlined_call_operand.vmem [shape: bf16[2,4,17,16], index: 3, kind: output, shape index: {}]  }
   0x1 LB: > { %s1129_s13 = sadd.s32 4294967295, %s1396_s12   ;;  %p1133_p0 = scmp.ge.s32.totalorder %s1396_s12, 1  ;;  %s1396_s12 = sphi %s1419_s12, %s13_s12  }
   0x2   : > { %p157_p1 = scmp.lt.s32.totalorder %s1396_s12, 3 }
   0x4   : > { %p158_p2 = pnand %p1133_p0, %p157_p1 }
   0x5   : > { %p191_p3 = scmp.lt.s32.totalorder (!%p158_p2), %s1129_s13, 1 }
   0x6   : > { %161 = sbr.rel (%p158_p2) target bundleno = 774 (0x306), region = 32 }
   0xb   : > { %s1639_s13 = smov (!%p191_p3, %s1129_s13), 1  ;;  %vm264_vm0 = vcmask 130048   ;;  %vm572_vm1 = vcmask 131072   ;;  %vm565_vm2 = vcmask 138240   ;;  %vm722_vm3 = vcmask 1040384  }
   0xc   : > { %s1427_s14 = smul.u32 48, %s1639_s13  ;;  %vm1029_vm4 = vcmask 122880   ;;  %vm1030_vm5 = vsmask.f32 256  ;;  %vm1026_vm7 = vcmask 125952  }
   0xd   : > { %vm1593_vm6 = vmand %vm1029_vm4, %vm1030_vm5 }
   0xe   : > { %s1433_s17 = scalar_lea.vmem %s1633_s1, %s1427_s14  ;;  %s1443_s20 = scalar_lea.vmem %s1632_s0, %s1427_s14 }
   0xf   : > { %v1318_v0 = vld [vmem:[%s1433_s17 + $0x8] ss:$0 sps:$4 sm:$0x11]   ;;  %v1320_v1 = vld [vmem:[%s1433_s17] sm:$0xff]   ;;  %v1321_v3 = vld [vmem:[%s1433_s17 + $0xc] sm:$0xff]   ;;  %s1551_s23 = scalar_lea.vmem %s1634_s2, %s1427_s14  ;;  %s1591_s26 = scalar_lea.vmem %s1635_s3, %s1427_s14 }
  0x10   : > { %v1319_v2 = vld [vmem:[%s1433_s17 + $0x14] ss:$0 sps:$4 sm:$0x11]   ;;  %1300 = vmatprep.subr.msk.bf16.mxu0 %vm264_vm0, %v1318_v0  ;;  %v275_v4 = vsel %vm264_vm0, %v1318_v0, 0  ;;  %v1322_v6 = vld [vmem:[%s1443_s20] sm:$0xff]   ;;  %v1323_v7 = vld [vmem:[%s1443_s20 + $0xc] sm:$0xff]  }
  0x11   : > { %1302 = vmatprep.subr.msk.bf16.mxu1 %vm264_vm0, %v1319_v2  ;;  %1237 = vmatpush3.bf16.xpose.msra.mxu0 %v275_v4  ;;  %v351_v5 = vsel %vm264_vm0, %v1319_v2, 0  ;;  %v272_v8 = vsel %vm264_vm0, %v1320_v1, 0  ;;  %v1326_v9 = vld [vmem:[%s1433_s17 + $0x20] ss:$0 sps:$4 sm:$0x11]   ;;  %v348_v10 = vsel %vm264_vm0, %v1321_v3, 0 }
  0x12   : > { %1245 = vmatpush3.bf16.xpose.msra.mxu1 %v351_v5  ;;  %1301 = vmatprep.subr.msk.bf16.mxu0 %vm264_vm0, %v1320_v1  ;;  %v1327_v11 = vld [vmem:[%s1433_s17 + $0x2c] ss:$0 sps:$4 sm:$0x11]   ;;  %v1324_v12 = vld [vmem:[%s1443_s20 + $0x8] ss:$0 sps:$4 sm:$0x11]  }
  0x13   : > { %1303 = vmatprep.subr.msk.bf16.mxu1 %vm264_vm0, %v1321_v3  ;;  %1240 = vmatprep.mubr.msk.bf16.mxu0 %vm264_vm0, %v1322_v6  ;;  %v1325_v13 = vld [vmem:[%s1443_s20 + $0x14] ss:$0 sps:$4 sm:$0x11]   ;;  %v427_v14 = vsel %vm264_vm0, %v1326_v9, 0  ;;  %v1328_v15 = vld [vmem:[%s1433_s17 + $0x18] sm:$0xff]   ;;  %v503_v16 = vsel %vm264_vm0, %v1327_v11, 0 }
  0x14   : > { %1248 = vmatprep.mubr.msk.bf16.mxu1 %vm264_vm0, %v1323_v7  ;;  %v1329_v17 = vld [vmem:[%s1433_s17 + $0x24] sm:$0xff]   ;;  %v1330_v18 = vld [vmem:[%s1443_s20 + $0x18] sm:$0xff]   ;;  %v424_v20 = vsel %vm264_vm0, %v1328_v15, 0  ;;  %v1332_v22 = vld [vmem:[%s1443_s20 + $0x20] ss:$0 sps:$4 sm:$0x11]  }
  0x15   : > { %v1331_v19 = vld [vmem:[%s1443_s20 + $0x24] sm:$0xff]   ;;  %v500_v21 = vsel %vm264_vm0, %v1329_v17, 0  ;;  %v1333_v23 = vld [vmem:[%s1443_s20 + $0x2c] ss:$0 sps:$4 sm:$0x11]  }
  0x19   : > { %1239 = vmatpush3.bf16.xpose.msra.mxu0 %v272_v8 }
  0x1a   : > { %1247 = vmatpush3.bf16.xpose.msra.mxu1 %v348_v10  ;;  %1304 = vmatprep.subr.msk.bf16.mxu0 %vm264_vm0, %v1326_v9 }
  0x1b   : > { %1306 = vmatprep.subr.msk.bf16.mxu1 %vm264_vm0, %v1327_v11 }
  0x20   : > { %1241 = vmatmul.mubr.msk.bf16.vlgmr.msra.gmra.mxu0 %vm264_vm0, %v1324_v12 }
  0x21   : > { %1249 = vmatmul.mubr.msk.bf16.vlgmr.msra.gmra.mxu1 %vm264_vm0, %v1325_v13  ;;  %1253 = vmatpush3.bf16.xpose.msra.mxu0 %v427_v14 }
  0x22   : > { %1261 = vmatpush3.bf16.xpose.msra.mxu1 %v503_v16  ;;  %1305 = vmatprep.subr.msk.bf16.mxu0 %vm264_vm0, %v1328_v15 }
  0x23   : > { %1307 = vmatprep.subr.msk.bf16.mxu1 %vm264_vm0, %v1329_v17  ;;  %1256 = vmatprep.mubr.msk.bf16.mxu0 %vm264_vm0, %v1330_v18 }
  0x24   : > { %1264 = vmatprep.mubr.msk.bf16.mxu1 %vm264_vm0, %v1331_v19 }
  0x29   : > { %1255 = vmatpush3.bf16.xpose.msra.mxu0 %v424_v20 }
  0x2a   : > { %1263 = vmatpush3.bf16.xpose.msra.mxu1 %v500_v21 }
  0x30   : > { %1257 = vmatmul.mubr.msk.bf16.vlgmr.msra.gmra.mxu0 %vm264_vm0, %v1332_v22 }
  0x31   : > { %1265 = vmatmul.mubr.msk.bf16.vlgmr.msra.gmra.mxu1 %vm264_vm0, %v1333_v23 }
  0xe0   : > { %v1242_v24 = vpop.f32.mrf.mxu0 }
  0xe1   : > { %v555_v25 = vmul.f32 0.25, %v1242_v24  ;;  %v1250_v26 = vpop.f32.mrf.mxu1 }
  0xe2   : > { %v558_v27 = vmul.f32 0.25, %v1250_v26  ;;  %v311_v28 = vpop.f32.mrf.mxu0 }
  0xe3   : > { %v553_v29 = vmul.f32 0.25, %v311_v28  ;;  %v387_v30 = vpop.f32.mrf.mxu1  ;;  %v573_v31 = vsel %vm572_vm1, %v555_v25, -inf }
  0xe4   : > { %v556_v32 = vmul.f32 0.25, %v387_v30  ;;  %v582_v33 = vsel %vm572_vm1, %v558_v27, -inf  ;;  %574 = vmax.xlane.f32.xlu0 %v573_v31  ;;  %v1243_v34 = vpop.f32.mrf.mxu0 }
  0xe5   : > { %583 = vmax.xlane.f32.xlu1 %v582_v33  ;;  %v1251_v35 = vpop.f32.mrf.mxu1  ;;  %v566_v40 = vsel %vm565_vm2, %v553_v29, -inf }
  0xe6   : > { %v314_v36 = vpop.f32.mrf.mxu0  ;;  %v576_v37 = vsel %vm565_vm2, %v556_v32, -inf }
  0xe7   : > { %v554_v38 = vmul.f32 0.25, %v314_v36  ;;  %v390_v39 = vpop.f32.mrf.mxu1 }
  0xe8   : > { %v557_v41 = vmul.f32 0.25, %v390_v39  ;;  %567 = vmax.xlane.f32.xlu0 %v566_v40 }
  0xe9   : > { %577 = vmax.xlane.f32.xlu1 %v576_v37  ;;  %v569_v42 = vsel %vm565_vm2, %v554_v38, -inf }
  0xea   : > { %v579_v43 = vsel %vm565_vm2, %v557_v41, -inf }
  0xec   : > { %570 = vmax.xlane.f32.xlu0 %v569_v42 }
  0xed   : > { %580 = vmax.xlane.f32.xlu1 %v579_v43 }
  0xf0   : > { %v1258_v44 = vpop.f32.mrf.mxu0 }
  0xf1   : > { %v1266_v45 = vpop.f32.mrf.mxu1  ;;  %v1488_v56 = vmul.f32 0.25, %v1258_v44 }
  0xf2   : > { %v463_v46 = vpop.f32.mrf.mxu0  ;;  %v1494_v60 = vmul.f32 0.25, %v1266_v45 }
  0xf3   : > { %v559_v47 = vmul.f32 0.25, %v463_v46  ;;  %v539_v48 = vpop.f32.mrf.mxu1  ;;  %v591_v61 = vsel %vm572_vm1, %v1488_v56, -inf }
  0xf4   : > { %v1259_v49 = vpop.f32.mrf.mxu0  ;;  %v562_v50 = vmul.f32 0.25, %v539_v48  ;;  %v600_v63 = vsel %vm572_vm1, %v1494_v60, -inf }
  0xf5   : > { %v1267_v51 = vpop.f32.mrf.mxu1  ;;  %v585_v52 = vsel %vm565_vm2, %v559_v47, -inf }
  0xf6   : > { %586 = vmax.xlane.f32.xlu0 %v585_v52  ;;  %v466_v53 = vpop.f32.mrf.mxu0  ;;  %v594_v58 = vsel %vm565_vm2, %v562_v50, -inf }
  0xf7   : > { %v542_v54 = vpop.f32.mrf.mxu1  ;;  %v560_v55 = vmul.f32 0.25, %v466_v53 }
  0xf8   : > { %v1490_v57 = vmul.f32 0.25, %v542_v54 }
  0xf9   : > { %v588_v59 = vsel %vm565_vm2, %v560_v55, -inf }
  0xfa   : > { %595 = vmax.xlane.f32.xlu0 %v594_v58  ;;  %589 = vmax.xlane.f32.xlu1 %v588_v59  ;;  %v597_v62 = vsel %vm565_vm2, %v1490_v57, -inf  ;;  %v1334_v58 = vld [vmem:[%s1551_s23 + $0x8] ss:$0 sps:$4 sm:$0x11]  }
  0xfe   : > { %592 = vmax.xlane.f32.xlu0 %v591_v61  ;;  %598 = vmax.xlane.f32.xlu1 %v597_v62 }
 0x102   : > { %601 = vmax.xlane.f32.xlu1 %v600_v63 }
 0x16d   : > { %v575_v0 = vpop.xlane.xlu0 %574 }
 0x16e   : > { %v584_v1 = vpop.xlane.xlu1 %583  ;;  %v605_v2 = vsub.f32 %v555_v25, %v575_v0  ;;  %v1336_v0 = vld [vmem:[%s1551_s23 + $0x14] ss:$0 sps:$4 sm:$0x11]  }
 0x16f   : > { %v608_v3 = vsub.f32 %v558_v27, %v584_v1  ;;  %v1335_v1 = vld [vmem:[%s1551_s23] sm:$0xff]  }
 0x170   : > { %v619_v4 = vmul.f32 1.442695, %v605_v2 }
 0x171   : > { %v625_v5 = vmul.f32 1.442695, %v608_v3  ;;  %v568_v6 = vpop.xlane.xlu0 %567  ;;  %v1337_v3 = vld [vmem:[%s1551_s23 + $0xc] sm:$0xff]  }
 0x172   : > { %1342 = vpow2.f32 %v619_v4  ;;  %v578_v7 = vpop.xlane.xlu1 %577  ;;  %v603_v8 = vsub.f32 %v553_v29, %v568_v6  ;;  %v1338_v4 = vld [vmem:[%s1551_s23 + $0x20] ss:$0 sps:$4 sm:$0x11]  }
 0x173   : > { %1344 = vpow2.f32 %v625_v5  ;;  %v606_v9 = vsub.f32 %v556_v32, %v578_v7  ;;  %v1339_v5 = vld [vmem:[%s1551_s23 + $0x2c] ss:$0 sps:$4 sm:$0x11]  }
 0x174   : > { %v615_v10 = vmul.f32 1.442695, %v603_v8 }
 0x175   : > { %v621_v11 = vmul.f32 1.442695, %v606_v9  ;;  %v571_v12 = vpop.xlane.xlu0 %570 }
 0x176   : > { %1346 = vpow2.f32 %v615_v10  ;;  %v581_v13 = vpop.xlane.xlu1 %580  ;;  %v604_v14 = vsub.f32 %v554_v38, %v571_v12 }
 0x177   : > { %1348 = vpow2.f32 %v621_v11  ;;  %v607_v15 = vsub.f32 %v557_v41, %v581_v13 }
 0x178   : > { %v617_v16 = vmul.f32 1.442695, %v604_v14 }
 0x179   : > { %v623_v17 = vmul.f32 1.442695, %v607_v15 }
 0x17a   : > { %1350 = vpow2.f32 %v617_v16 }
 0x17b   : > { %1352 = vpow2.f32 %v623_v17 }
 0x17f   : > { %v1502_v18 = vpop.eup %1342  ;;  %v587_v19 = vpop.xlane.xlu0 %586 }
 0x180   : > { %v1504_v20 = vpop.eup %1344  ;;  %v609_v21 = vsub.f32 %v559_v47, %v587_v19  ;;  %v645_v22 = vsel %vm572_vm1, %v1502_v18, 0.0 }
 0x181   : > { %646 = vadd.xlane.f32.xlu0 %v645_v22  ;;  %v654_v23 = vsel %vm572_vm1, %v1504_v20, 0.0 }
 0x182   : > { %v627_v24 = vmul.f32 1.442695, %v609_v21  ;;  %655 = vadd.xlane.f32.xlu1 %v654_v23 }
 0x183   : > { %v1510_v25 = vpop.eup %1346  ;;  %v596_v26 = vpop.xlane.xlu0 %595 }
 0x184   : > { %v590_v27 = vpop.xlane.xlu1 %589  ;;  %v1512_v28 = vpop.eup %1348  ;;  %1354 = vpow2.f32 %v627_v24  ;;  %v612_v29 = vsub.f32 %v562_v50, %v596_v26  ;;  %v639_v31 = vsel %vm565_vm2, %v1510_v25, 0.0 }
 0x185   : > { %v610_v30 = vsub.f32 %v560_v55, %v590_v27  ;;  %640 = vadd.xlane.f32.xlu0 %v639_v31  ;;  %v648_v37 = vsel %vm565_vm2, %v1512_v28, 0.0 }
 0x186   : > { %v633_v32 = vmul.f32 1.442695, %v612_v29 }
 0x187   : > { %v629_v33 = vmul.f32 1.442695, %v610_v30  ;;  %v1516_v34 = vpop.eup %1350  ;;  %v593_v35 = vpop.xlane.xlu0 %592 }
 0x188   : > { %v599_v36 = vpop.xlane.xlu1 %598  ;;  %1356 = vpow2.f32 %v633_v32  ;;  %v611_v38 = vsub.f32 %v1488_v56, %v593_v35  ;;  %v642_v40 = vsel %vm565_vm2, %v1516_v34, 0.0  ;;  %v1524_v41 = vpop.eup %1352 }
 0x189   : > { %v613_v39 = vsub.f32 %v1490_v57, %v599_v36  ;;  %1358 = vpow2.f32 %v629_v33  ;;  %649 = vadd.xlane.f32.xlu0 %v648_v37  ;;  %643 = vadd.xlane.f32.xlu1 %v642_v40  ;;  %v651_v46 = vsel %vm565_vm2, %v1524_v41, 0.0  ;;  %v1340_v37 = vld [vmem:[%s1551_s23 + $0x18] sm:$0xff]  }
 0x18a   : > { %v631_v42 = vmul.f32 1.442695, %v611_v38  ;;  %v1341_v38 = vld [vmem:[%s1551_s23 + $0x24] sm:$0xff]  }
 0x18b   : > { %v635_v43 = vmul.f32 1.442695, %v613_v39 }
 0x18c   : > { %v602_v44 = vpop.xlane.xlu1 %601  ;;  %1360 = vpow2.f32 %v631_v42 }
 0x18d   : > { %v614_v45 = vsub.f32 %v1494_v60, %v602_v44  ;;  %1362 = vpow2.f32 %v635_v43  ;;  %652 = vadd.xlane.f32.xlu1 %v651_v46  ;;  %v1398_v60 = vmov 0  }
 0x18e   : > { %v724_v61 = vsel %vm722_vm3, 65535, %v1398_v60 }
 0x18f   : > { %v637_v47 = vmul.f32 1.442695, %v614_v45  ;;  %v726_v63 = vand.u32 %v1334_v58, %v724_v61  ;;  %v792_v2 = vand.u32 %v1336_v0, %v724_v61  ;;  %v858_v6 = vand.u32 %v1338_v4, %v724_v61 }
 0x190   : > { %v924_v7 = vand.u32 %v1339_v5, %v724_v61 }
 0x191   : > { %1364 = vpow2.f32 %v637_v47  ;;  %v1529_v48 = vpop.eup %1354  ;;  %1268 = vmatprep.subr.bf16.mxu0 %v726_v63  ;;  %1276 = vmatprep.subr.bf16.mxu1 %v792_v2 }
 0x192   : > { %v657_v49 = vsel %vm565_vm2, %v1529_v48, 0.0  ;;  %1269 = vmatpush3.bf16.msra.mxu0 %v726_v63  ;;  %1277 = vmatpush3.bf16.msra.mxu1 %v792_v2 }
 0x193   : > { %658 = vadd.xlane.f32.xlu0 %v657_v49  ;;  %1270 = vmatprep.subr.bf16.mxu0 %v1335_v1 }
 0x194   : > { %1278 = vmatprep.subr.bf16.mxu1 %v1337_v3 }
 0x195   : > { %v1533_v50 = vpop.eup %1356 }
 0x196   : > { %v1535_v51 = vpop.eup %1358  ;;  %v666_v52 = vsel %vm565_vm2, %v1533_v50, 0.0  ;;  %1271 = vmatpush3.bf16.msra.mxu0 %v1335_v1  ;;  %1279 = vmatpush3.bf16.msra.mxu1 %v1337_v3 }
 0x197   : > { %667 = vadd.xlane.f32.xlu0 %v666_v52  ;;  %v660_v53 = vsel %vm565_vm2, %v1535_v51, 0.0  ;;  %1284 = vmatprep.subr.bf16.mxu0 %v858_v6 }
 0x198   : > { %661 = vadd.xlane.f32.xlu1 %v660_v53  ;;  %1292 = vmatprep.subr.bf16.mxu1 %v924_v7 }
 0x199   : > { %v1541_v54 = vpop.eup %1360 }
 0x19a   : > { %v1543_v55 = vpop.eup %1362  ;;  %v663_v56 = vsel %vm572_vm1, %v1541_v54, 0.0 }
 0x19b   : > { %664 = vadd.xlane.f32.xlu0 %v663_v56  ;;  %v669_v57 = vsel %vm565_vm2, %v1543_v55, 0.0 }
 0x19c   : > { %670 = vadd.xlane.f32.xlu1 %v669_v57 }
 0x19e   : > { %v1556_v59 = vpop.eup %1364 }
 0x19f   : > { %v672_v62 = vsel %vm572_vm1, %v1556_v59, 0.0 }
 0x1a0   : > { %673 = vadd.xlane.f32.xlu1 %v672_v62  ;;  %v1037_v62 = vld [vmem:[%s1591_s26 + $0x14] sm:$0x1] }
 0x20a   : > { %v647_v8 = vpop.xlane.xlu0 %646 }
 0x20b   : > { %v656_v9 = vpop.xlane.xlu1 %655  ;;  %1366 = vrcp.f32 %v647_v8 }
 0x20e   : > { %v641_v10 = vpop.xlane.xlu0 %640 }
 0x20f   : > { %1368 = vrcp.f32 %v641_v10  ;;  %v1042_v10 = vld [vmem:[%s1591_s26 + $0x20] sm:$0x1] }
 0x210   : > { %1370 = vrcp.f32 %v656_v9 }
 0x212   : > { %v650_v11 = vpop.xlane.xlu0 %649  ;;  %v644_v12 = vpop.xlane.xlu1 %643 }
 0x213   : > { %1372 = vrcp.f32 %v644_v12 }
 0x214   : > { %1374 = vrcp.f32 %v650_v11 }
 0x216   : > { %v653_v13 = vpop.xlane.xlu1 %652 }
 0x217   : > { %1376 = vrcp.f32 %v653_v13 }
 0x218   : > { %v1367_v15 = vpop.eup %1366 }
 0x219   : > { %v689_v23 = vmul.f32 %v1367_v15, %v1502_v18 }
 0x21b   : > { %v700_v35 = vpack.c.bf16 %v689_v23, %v689_v23 }
 0x21c   : > { %v659_v14 = vpop.xlane.xlu0 %658  ;;  %v1369_v16 = vpop.eup %1368 }
 0x21d   : > { %v1371_v17 = vpop.eup %1370  ;;  %1378 = vrcp.f32 %v659_v14  ;;  %v687_v26 = vmul.f32 %v1369_v16, %v1510_v25 }
 0x21e   : > { %v692_v32 = vmul.f32 %v1371_v17, %v1504_v20  ;;  %v1047_v17 = vld [vmem:[%s1591_s26 + $0x2c] sm:$0x1] }
 0x220   : > { %v668_v19 = vpop.xlane.xlu0 %667  ;;  %v1373_v21 = vpop.eup %1372 }
 0x221   : > { %v662_v22 = vpop.xlane.xlu1 %661  ;;  %v1375_v24 = vpop.eup %1374  ;;  %v688_v27 = vmul.f32 %v1373_v21, %v1516_v34  ;;  %v702_v34 = vpack.c.bf16 %v692_v32, %v692_v32 }
 0x222   : > { %1380 = vrcp.f32 %v662_v22  ;;  %v690_v36 = vmul.f32 %v1375_v24, %v1512_v28 }
 0x223   : > { %1382 = vrcp.f32 %v668_v19  ;;  %v699_v31 = vpack.c.bf16 %v688_v27, %v687_v26 }
 0x224   : > { %v1377_v29 = vpop.eup %1376  ;;  %v665_v30 = vpop.xlane.xlu0 %664 }
 0x225   : > { %1384 = vrcp.f32 %v665_v30  ;;  %v671_v33 = vpop.xlane.xlu1 %670  ;;  %v691_v18 = vmul.f32 %v1377_v29, %v1524_v41  ;;  %1272 = vmatprep.mubr.msk.bf16.mxu0 %vm565_vm2, %v699_v31 }
 0x226   : > { %1386 = vrcp.f32 %v671_v33  ;;  %1273 = vmatmul.mubr.msk.bf16.vlgmr.msra.gmra.mxu0 %vm565_vm2, %v700_v35 }
 0x227   : > { %v701_v25 = vpack.c.bf16 %v691_v18, %v690_v36  ;;  %1285 = vmatpush3.bf16.msra.mxu0 %v858_v6 }
 0x228   : > { %1286 = vmatprep.subr.bf16.mxu0 %v1340_v37 }
 0x229   : > { %v674_v39 = vpop.xlane.xlu1 %673  ;;  %1280 = vmatprep.mubr.msk.bf16.mxu1 %vm565_vm2, %v701_v25 }
 0x22a   : > { %1388 = vrcp.f32 %v674_v39  ;;  %1281 = vmatmul.mubr.msk.bf16.vlgmr.msra.gmra.mxu1 %vm565_vm2, %v702_v34  ;;  %v1379_v20 = vpop.eup %1378 }
 0x22b   : > { %1293 = vmatpush3.bf16.msra.mxu1 %v924_v7  ;;  %1287 = vmatpush3.bf16.msra.mxu0 %v1340_v37  ;;  %v693_v40 = vmul.f32 %v1379_v20, %v1529_v48 }
 0x22c   : > { %1294 = vmatprep.subr.bf16.mxu1 %v1341_v38 }
 0x22f   : > { %v1381_v28 = vpop.eup %1380  ;;  %1295 = vmatpush3.bf16.msra.mxu1 %v1341_v38 }
 0x230   : > { %v694_v41 = vmul.f32 %v1381_v28, %v1535_v51  ;;  %v1383_v42 = vpop.eup %1382 }
 0x231   : > { %v696_v47 = vmul.f32 %v1383_v42, %v1533_v50 }
 0x232   : > { %v1385_v43 = vpop.eup %1384  ;;  %v703_v44 = vpack.c.bf16 %v694_v41, %v693_v40 }
 0x233   : > { %v1387_v45 = vpop.eup %1386  ;;  %v695_v46 = vmul.f32 %v1385_v43, %v1541_v54 }
 0x234   : > { %1288 = vmatprep.mubr.msk.bf16.mxu0 %vm565_vm2, %v703_v44  ;;  %v697_v49 = vmul.f32 %v1387_v45, %v1543_v55  ;;  %v1032_v55 = vld [vmem:[%s1591_s26 + $0x8] sm:$0x1] }
 0x235   : > { %v704_v52 = vpack.c.bf16 %v695_v46, %v695_v46 }
 0x236   : > { %v705_v53 = vpack.c.bf16 %v697_v49, %v696_v47 }
 0x237   : > { %v1389_v56 = vpop.eup %1388  ;;  %1289 = vmatmul.mubr.msk.bf16.vlgmr.msra.gmra.mxu0 %vm565_vm2, %v704_v52 }
 0x238   : > { %1296 = vmatprep.mubr.msk.bf16.mxu1 %vm565_vm2, %v705_v53  ;;  %v698_v48 = vmul.f32 %v1389_v56, %v1556_v59 }
 0x23a   : > { %v706_v51 = vpack.c.bf16 %v698_v48, %v698_v48 }
 0x23c   : > { %1297 = vmatmul.mubr.msk.bf16.vlgmr.msra.gmra.mxu1 %vm565_vm2, %v706_v51 }
 0x2e6   : > { %v1274_v50 = vpop.f32.mrf.mxu0 }
 0x2e7   : > { %v1194_v57 = vpack.c.bf16 %v1274_v50, %v1274_v50 }
 0x2e8   : > { %v762_v58 = vpop.f32.mrf.mxu0 }
 0x2e9   : > { %v1033_v59 = vsel %vm1593_vm6, %v1194_v57, %v1032_v55  ;;  %v1192_v60 = vpack.c.bf16 %v762_v58, %v762_v58 }
 0x2ea   : > { %v1282_v61 = vpop.f32.mrf.mxu1  ;;  %1034 = vst [vmem:[%s1591_s26 + $0x8] sm:$0x1] %v1033_v59  ;;  %v1275_v63 = vpop.f32.mrf.mxu0 }
 0x2eb   : > { %v1197_v0 = vpack.c.bf16 %v1282_v61, %v1282_v61  ;;  %1027 = vst.msk [vmem:[%s1591_s26] sm:$0xf] %vm1026_vm7, %v1192_v60 }
 0x2ec   : > { %v828_v1 = vpop.f32.mrf.mxu1  ;;  %v765_v3 = vpop.f32.mrf.mxu0 }
 0x2ed   : > { %v1038_v2 = vsel %vm1593_vm6, %v1197_v0, %v1037_v62  ;;  %v1195_v4 = vpack.c.bf16 %v828_v1, %v828_v1  ;;  %v1193_v5 = vpack.c.bf16 %v765_v3, %v765_v3 }
 0x2ee   : > { %1039 = vst [vmem:[%s1591_s26 + $0x14] sm:$0x1] %v1038_v2  ;;  %v1283_v6 = vpop.f32.mrf.mxu1 }
 0x2ef   : > { %1035 = vst.msk [vmem:[%s1591_s26 + $0xc] sm:$0xf] %vm1026_vm7, %v1195_v4  ;;  %1028 = vst.msk [vmem:[%s1591_s26 + $0x4] sm:$0xf] %vm1026_vm7, %v1193_v5 }
 0x2f0   : > { %v831_v7 = vpop.f32.mrf.mxu1 }
 0x2f1   : > { %v1196_v8 = vpack.c.bf16 %v831_v7, %v831_v7 }
 0x2f3   : > { %1036 = vst.msk [vmem:[%s1591_s26 + $0x10] sm:$0xf] %vm1026_vm7, %v1196_v8 }
 0x2f7   : > { %v1290_v9 = vpop.f32.mrf.mxu0 }
 0x2f8   : > { %v1200_v11 = vpack.c.bf16 %v1290_v9, %v1290_v9 }
 0x2f9   : > { %v894_v12 = vpop.f32.mrf.mxu0 }
 0x2fa   : > { %v1043_v13 = vsel %vm1593_vm6, %v1200_v11, %v1042_v10  ;;  %v1198_v14 = vpack.c.bf16 %v894_v12, %v894_v12 }
 0x2fb   : > { %1044 = vst [vmem:[%s1591_s26 + $0x20] sm:$0x1] %v1043_v13  ;;  %v1291_v15 = vpop.f32.mrf.mxu0 }
 0x2fc   : > { %1040 = vst.msk [vmem:[%s1591_s26 + $0x18] sm:$0xf] %vm1026_vm7, %v1198_v14  ;;  %v1298_v16 = vpop.f32.mrf.mxu1 }
 0x2fd   : > { %v1203_v19 = vpack.c.bf16 %v1298_v16, %v1298_v16  ;;  %v897_v21 = vpop.f32.mrf.mxu0 }
 0x2fe   : > { %v1199_v22 = vpack.c.bf16 %v897_v21, %v897_v21  ;;  %v960_v23 = vpop.f32.mrf.mxu1 }
 0x2ff   : > { %v1048_v24 = vsel %vm1593_vm6, %v1203_v19, %v1047_v17  ;;  %v1201_v26 = vpack.c.bf16 %v960_v23, %v960_v23 }
 0x300   : > { %1049 = vst [vmem:[%s1591_s26 + $0x2c] sm:$0x1] %v1048_v24  ;;  %1041 = vst.msk [vmem:[%s1591_s26 + $0x1c] sm:$0xf] %vm1026_vm7, %v1199_v22  ;;  %v1299_v27 = vpop.f32.mrf.mxu1 }
 0x301   : > { %1045 = vst.msk [vmem:[%s1591_s26 + $0x24] sm:$0xf] %vm1026_vm7, %v1201_v26 }
 0x302   : > { %v963_v29 = vpop.f32.mrf.mxu1 }
 0x303   : > { %v1202_v30 = vpack.c.bf16 %v963_v29, %v963_v29 }
 0x305   : > { %1046 = vst.msk [vmem:[%s1591_s26 + $0x28] sm:$0xf] %vm1026_vm7, %v1202_v30 }
 0x306 PF: > { %s13_s12 = sadd.s32 1, %s1396_s12  }
 0x307   : > { %p10_p4 = scmp.ge.s32.totalorder %s13_s12, 4  }
 0x309   :  { %12 = sbr.rel (!%p10_p4) target bundleno = 1 (0x1), region = 68 }

// kernel: vit_forward.11
= control target key start
LH: loop header
LB: loop body
LE: loop exit
PB: predicated region body
PF: predicated region fallthrough
CT: control target
= control target key end

     0   :  { %v825_v0 = vmov 0.0   ;;  %vm826_vm0 = vmmov 0   ;;  %vm98_vm1 = vcmask 523264   ;;  %vm183_vm2 = vcmask 517120   ;;  %s1095_s2 = inlined_call_operand.vmem [shape: bf16[64,64], index: 2, kind: input, shape index: {}]   ;;  %s1096_s1 = inlined_call_operand.vmem [shape: bf16[34,64], index: 1, kind: input, shape index: {}]   ;;  %s1097_s3 = inlined_call_operand.vmem [shape: f32[1,64], index: 3, kind: input, shape index: {}]   ;;  %s1098_s0 = inlined_call_operand.vmem [shape: f32[34,64], index: 0, kind: input, shape index: {}]   ;;  %s1099_s6 = inlined_call_operand.vmem [shape: bf16[64,256], index: 6, kind: input, shape index: {}]   ;;  %s1100_s4 = inlined_call_operand.vmem [shape: f32[1,64], index: 4, kind: input, shape index: {}]   ;;  %s1101_s5 = inlined_call_operand.vmem [shape: f32[1,64], index: 5, kind: input, shape index: {}]   ;;  %s1102_s8 = inlined_call_operand.vmem [shape: bf16[256,64], index: 8, kind: input, shape index: {}]   ;;  %s1103_s7 = inlined_call_operand.vmem [shape: f32[1,256], index: 7, kind: input, shape index: {}]   ;;  %s1104_s9 = inlined_call_operand.vmem [shape: f32[1,64], index: 9, kind: input, shape index: {}]   ;;  %s1105_s10 = inlined_call_operand.vmem [shape: f32[34,64], index: 10, kind: output, shape index: {}]  }
   0x1   :  { %737 = vmatprep.subr.bf16.mxu1 %v825_v0  ;;  %v760_v1 = vld [vmem:[%s1095_s2 + $0x18] sm:$0xff]   ;;  %745 = vmatprep.mubr.msk.bf16.mxu1 %vm826_vm0, %v825_v0  ;;  %v761_v2 = vld [vmem:[%s1095_s2 + $0x10] sm:$0xff]   ;;  %v762_v3 = vld [vmem:[%s1095_s2 + $0x8] sm:$0xff]  }
   0x2   :  { %738 = vmatpush3.bf16.msra.mxu1 %v760_v1  ;;  %v763_v4 = vld [vmem:[%s1095_s2] sm:$0xff]   ;;  %v765_v6 = vld [vmem:[%s1096_s1 + $0x8] sm:$0xff]   ;;  %v766_v7 = vld [vmem:[%s1096_s1 + $0x10] ss:$0 sps:$4 sm:$0x11]  }
   0x3   :  { %739 = vmatprep.subr.bf16.mxu1 %v825_v0  ;;  %v764_v5 = vld [vmem:[%s1096_s1] sm:$0xff]   ;;  %v37_v14 = vld [vmem:[%s1098_s0 + $0x8] sm:$0xff]  ;;  %v38_v20 = vld [vmem:[%s1098_s0 + $0x10] sm:$0xff] }
   0x4   :  { %v655_v8 = vld [vmem:[%s1097_s3] ss:$0 sm:$0xff]  ;;  %v39_v26 = vld [vmem:[%s1098_s0 + $0x18] sm:$0xff] }
   0x5   :  { %v36_v9 = vld [vmem:[%s1098_s0] sm:$0xff] }
   0x6   :  { %740 = vmatpush3.bf16.msra.mxu1 %v761_v2  ;;  %v40_v32 = vld [vmem:[%s1098_s0 + $0x20] sm:$0x3]  ;;  %v769_v2 = vld [vmem:[%s1099_s6 + $0x34] ss:$8 sps:$4 sm:$0xff]  }
   0x7   :  { %741 = vmatprep.subr.bf16.mxu1 %v825_v0 }
   0xa   :  { %742 = vmatpush3.bf16.msra.mxu1 %v762_v3  ;;  %v767_v3 = vld [vmem:[%s1099_s6 + $0x30] ss:$8 sps:$4 sm:$0xff]  }
   0xb   :  { %743 = vmatprep.subr.bf16.mxu1 %v825_v0 }
   0xe   :  { %744 = vmatpush3.bf16.msra.mxu1 %v763_v4  ;;  %v772_v4 = vld [vmem:[%s1099_s6 + $0x24] ss:$8 sps:$4 sm:$0xff]  }
   0xf   :  { %340 = vmatprep.subr.bf16.mxu1 %v769_v2  ;;  %v789_v2 = vld [vmem:[%s1102_s8 + $0x50] sm:$0xff]  }
  0x11   :  { %746 = vmatmul.mubr.msk.bf16.vlgmr.msra.gmra.mxu1 %vm98_vm1, %v764_v5  ;;  %v770_v5 = vld [vmem:[%s1099_s6 + $0x20] ss:$8 sps:$4 sm:$0xff]  }
  0x12   :  { %749 = vmatprep.mubr.msk.bf16.mxu1 %vm826_vm0, %v825_v0  ;;  %341 = vmatpush1.bf16.msra.mxu1 %v767_v3  ;;  %v790_v3 = vld [vmem:[%s1102_s8 + $0x10] sm:$0xff]  }
  0x13   :  { %342 = vmatprep.subr.bf16.mxu1 %v772_v4  ;;  %v791_v4 = vld [vmem:[%s1102_s8 + $0x48] sm:$0xff]  }
  0x16   :  { %343 = vmatpush1.bf16.msra.mxu1 %v770_v5  ;;  %v792_v5 = vld [vmem:[%s1102_s8 + $0x8] sm:$0xff]  }
  0x19   :  { %750 = vmatmul.mubr.msk.bf16.gmra.mxu1 %vm98_vm1, %v765_v6  ;;  %v775_v6 = vld [vmem:[%s1099_s6 + $0x14] ss:$8 sps:$4 sm:$0xff]  }
  0x1a   :  { %753 = vmatprep.mubr.msk.bf16.mxu1 %vm826_vm0, %v825_v0  ;;  %344 = vmatprep.subr.bf16.mxu1 %v775_v6  ;;  %v793_v6 = vld [vmem:[%s1102_s8 + $0x40] sm:$0xff]  }
  0x21   :  { %754 = vmatmul.mubr.msk.bf16.gmra.mxu1 %vm98_vm1, %v766_v7  ;;  %v773_v7 = vld [vmem:[%s1099_s6 + $0x10] ss:$8 sps:$4 sm:$0xff]  }
  0x22   :  { %345 = vmatpush1.bf16.msra.mxu1 %v773_v7  ;;  %v794_v7 = vld [vmem:[%s1102_s8] sm:$0xff]  }
  0xd1   :  { %v142_v10 = vpop.f32.mrf.mxu1 }
  0xd2   :  { %v143_v11 = vadd.f32 %v655_v8, %v142_v10  ;;  %v827_v10 = vmov 0  }
  0xd3   :  { %v747_v12 = vpop.f32.mrf.mxu1  ;;  %364 = vmatprep.mubr.bf16.mxu1 %v827_v10 }
  0xd4   :  { %v916_v13 = vadd.f32 %v143_v11, %v36_v9  ;;  %v778_v9 = vld [vmem:[%s1099_s6 + $0x4] ss:$8 sps:$4 sm:$0xff]  }
  0xd5   :  { %v145_v15 = vpop.f32.mrf.mxu1  ;;  %346 = vmatprep.subr.bf16.mxu1 %v778_v9 }
  0xd6   :  { %v146_v16 = vadd.f32 %v655_v8, %v145_v15  ;;  %v171_v17 = vsel %vm98_vm1, %v916_v13, 0.0 }
  0xd7   :  { %v748_v18 = vpop.f32.mrf.mxu1  ;;  %172 = vadd.xlane.f32.xlu0 %v171_v17 }
  0xd8   :  { %v923_v19 = vadd.f32 %v146_v16, %v37_v14 }
  0xd9   :  { %v150_v21 = vpop.f32.mrf.mxu1 }
  0xda   :  { %v151_v22 = vadd.f32 %v655_v8, %v150_v21  ;;  %v174_v23 = vsel %vm98_vm1, %v923_v19, 0.0 }
  0xdb   :  { %v751_v24 = vpop.f32.mrf.mxu1  ;;  %175 = vadd.xlane.f32.xlu0 %v174_v23 }
  0xdc   :  { %v930_v25 = vadd.f32 %v151_v22, %v38_v20 }
  0xdd   :  { %v153_v27 = vpop.f32.mrf.mxu1 }
  0xde   :  { %v154_v28 = vadd.f32 %v655_v8, %v153_v27  ;;  %v177_v29 = vsel %vm98_vm1, %v930_v25, 0.0 }
  0xdf   :  { %v752_v30 = vpop.f32.mrf.mxu1  ;;  %178 = vadd.xlane.f32.xlu1 %v177_v29 }
  0xe0   :  { %v937_v31 = vadd.f32 %v154_v28, %v39_v26 }
  0xe1   :  { %v158_v33 = vpop.f32.mrf.mxu1 }
  0xe2   :  { %v159_v34 = vadd.f32 %v655_v8, %v158_v33  ;;  %v180_v35 = vsel %vm98_vm1, %v937_v31, 0.0  ;;  %v776_v8 = vld [vmem:[%s1099_s6] ss:$8 sps:$4 sm:$0xff]  }
  0xe3   :  { %181 = vadd.xlane.f32.xlu1 %v180_v35  ;;  %v755_v36 = vpop.f32.mrf.mxu1  ;;  %347 = vmatpush1.bf16.msra.mxu1 %v776_v8  ;;  %v273_v8 = vlaneseq }
  0xe4   :  { %v944_v37 = vadd.f32 %v159_v34, %v40_v32  ;;  %v666_v32 = vld [vmem:[%s1100_s4] ss:$0 sm:$0xff] }
  0xe5   :  { %v161_v38 = vpop.f32.mrf.mxu1  ;;  %v667_v36 = vld [vmem:[%s1101_s5] ss:$0 sm:$0xff]  ;;  %v274_v9 = vshrl.u32 %v273_v8, 7 }
  0xe6   :  { %v184_v39 = vsel %vm183_vm2, %v944_v37, 0.0 }
  0xe7   :  { %185 = vadd.xlane.f32.xlu0 %v184_v39  ;;  %v756_v40 = vpop.f32.mrf.mxu1 }
 0x160   :  { %v173_v41 = vpop.xlane.xlu0 %172 }
 0x161   :  { %v188_v42 = vmul.f32 0.015625, %v173_v41 }
 0x163   :  { %v949_v43 = vsub.f32 %v916_v13, %v188_v42 }
 0x164   :  { %v176_v44 = vpop.xlane.xlu0 %175 }
 0x165   :  { %v189_v45 = vmul.f32 0.015625, %v176_v44  ;;  %v198_v46 = vmul.f32 %v949_v43, %v949_v43 }
 0x167   :  { %v954_v47 = vsub.f32 %v923_v19, %v189_v45  ;;  %v203_v48 = vsel %vm98_vm1, %v198_v46, 0.0 }
 0x168   :  { %v179_v49 = vpop.xlane.xlu1 %178  ;;  %204 = vadd.xlane.f32.xlu1 %v203_v48 }
 0x169   :  { %v190_v50 = vmul.f32 0.015625, %v179_v49  ;;  %v199_v51 = vmul.f32 %v954_v47, %v954_v47 }
 0x16b   :  { %v960_v52 = vsub.f32 %v930_v25, %v190_v50  ;;  %v206_v53 = vsel %vm98_vm1, %v199_v51, 0.0 }
 0x16c   :  { %v182_v54 = vpop.xlane.xlu1 %181  ;;  %207 = vadd.xlane.f32.xlu0 %v206_v53 }
 0x16d   :  { %v191_v55 = vmul.f32 0.015625, %v182_v54  ;;  %v200_v56 = vmul.f32 %v960_v52, %v960_v52 }
 0x16f   :  { %v966_v57 = vsub.f32 %v937_v31, %v191_v55  ;;  %v209_v58 = vsel %vm98_vm1, %v200_v56, 0.0  ;;  %v779_v56 = vld [vmem:[%s1102_s8 + $0x78] sm:$0xff]  }
 0x170   :  { %210 = vadd.xlane.f32.xlu1 %v209_v58  ;;  %v186_v59 = vpop.xlane.xlu0 %185  ;;  %703 = vmatprep.subr.bf16.mxu0 %v779_v56  ;;  %v781_v58 = vld [vmem:[%s1102_s8 + $0x70] sm:$0xff]  }
 0x171   :  { %v192_v60 = vmul.f32 0.015625, %v186_v59  ;;  %v201_v61 = vmul.f32 %v966_v57, %v966_v57  ;;  %v782_v59 = vld [vmem:[%s1102_s8 + $0x30] sm:$0xff]  }
 0x173   :  { %v972_v62 = vsub.f32 %v944_v37, %v192_v60  ;;  %v212_v63 = vsel %vm98_vm1, %v201_v61, 0.0  ;;  %v783_v60 = vld [vmem:[%s1102_s8 + $0x68] sm:$0xff]  }
 0x174   :  { %213 = vadd.xlane.f32.xlu0 %v212_v63  ;;  %v784_v61 = vld [vmem:[%s1102_s8 + $0x28] sm:$0xff]   ;;  %v786_v63 = vld [vmem:[%s1102_s8 + $0x20] sm:$0xff]  }
 0x175   :  { %v202_v0 = vmul.f32 %v972_v62, %v972_v62 }
 0x177   :  { %v215_v1 = vsel %vm183_vm2, %v202_v0, 0.0  ;;  %v787_v0 = vld [vmem:[%s1102_s8 + $0x58] sm:$0xff]  }
 0x178   :  { %216 = vadd.xlane.f32.xlu1 %v215_v1  ;;  %v788_v1 = vld [vmem:[%s1102_s8 + $0x18] sm:$0xff]  }
 0x1f1   :  { %v205_v11 = vpop.xlane.xlu1 %204 }
 0x1f2   :  { %v218_v12 = vmul.f32 0.015625, %v205_v11  ;;  %v271_v11 = vld [vmem:[%s1103_s7] sm:$0x3] }
 0x1f4   :  { %v223_v14 = vadd.f32 1e-05, %v218_v12  ;;  %v279_v12 = vsub.s32 1, %v274_v9 }
 0x1f5   :  { %v208_v15 = vpop.xlane.xlu0 %207 }
 0x1f6   :  { %795 = vrsqrt.f32 %v223_v14  ;;  %v219_v16 = vmul.f32 0.015625, %v208_v15  ;;  %v280_v15 = vrot.slane %v271_v11, %v279_v12 }
 0x1f8   :  { %v224_v17 = vadd.f32 1e-05, %v219_v16 }
 0x1f9   :  { %v211_v18 = vpop.xlane.xlu1 %210 }
 0x1fa   :  { %797 = vrsqrt.f32 %v224_v17  ;;  %v220_v20 = vmul.f32 0.015625, %v211_v18 }
 0x1fc   :  { %v225_v21 = vadd.f32 1e-05, %v220_v20 }
 0x1fd   :  { %v214_v22 = vpop.xlane.xlu0 %213 }
 0x1fe   :  { %799 = vrsqrt.f32 %v225_v21  ;;  %v221_v23 = vmul.f32 0.015625, %v214_v22 }
 0x200   :  { %v226_v24 = vadd.f32 1e-05, %v221_v23 }
 0x201   :  { %v217_v26 = vpop.xlane.xlu1 %216 }
 0x202   :  { %801 = vrsqrt.f32 %v226_v24  ;;  %v222_v27 = vmul.f32 0.015625, %v217_v26 }
 0x203   :  { %v796_v28 = vpop.eup %795 }
 0x204   :  { %v233_v29 = vmul.f32 %v796_v28, %v949_v43  ;;  %v227_v30 = vadd.f32 1e-05, %v222_v27 }
 0x206   :  { %803 = vrsqrt.f32 %v227_v30  ;;  %v244_v34 = vmul.f32 %v666_v32, %v233_v29 }
 0x207   :  { %v798_v33 = vpop.eup %797 }
 0x208   :  { %v234_v35 = vmul.f32 %v798_v33, %v954_v47  ;;  %v255_v40 = vadd.f32 %v667_v36, %v244_v34 }
 0x20a   :  { %v245_v38 = vmul.f32 %v666_v32, %v234_v35 }
 0x20b   :  { %v800_v39 = vpop.eup %799 }
 0x20c   :  { %v256_v41 = vadd.f32 %v667_v36, %v245_v38  ;;  %v235_v42 = vmul.f32 %v800_v39, %v960_v52 }
 0x20e   :  { %v260_v43 = vpack.c.bf16 %v256_v41, %v255_v40  ;;  %v246_v46 = vmul.f32 %v666_v32, %v235_v42 }
 0x20f   :  { %v802_v44 = vpop.eup %801 }
 0x210   :  { %676 = vmatmul.mubr.msk.bf16.vlgmr.msra.gmra.mxu1 %vm98_vm1, %v260_v43  ;;  %v236_v45 = vmul.f32 %v802_v44, %v966_v57  ;;  %v257_v49 = vadd.f32 %v667_v36, %v246_v46  ;;  %v780_v57 = vld [vmem:[%s1102_s8 + $0x38] sm:$0xff]  }
 0x211   :  { %374 = vmatprep.mubr.bf16.mxu1 %v827_v10  ;;  %704 = vmatpush3.bf16.msra.mxu0 %v780_v57 }
 0x212   :  { %v247_v48 = vmul.f32 %v666_v32, %v236_v45  ;;  %705 = vmatprep.subr.bf16.mxu0 %v781_v58 }
 0x213   :  { %v804_v47 = vpop.eup %803 }
 0x214   :  { %v258_v50 = vadd.f32 %v667_v36, %v247_v48  ;;  %v237_v51 = vmul.f32 %v804_v47, %v972_v62  ;;  %v785_v62 = vld [vmem:[%s1102_s8 + $0x60] sm:$0xff]  }
 0x215   :  { %706 = vmatpush3.bf16.msra.mxu0 %v782_v59 }
 0x216   :  { %v261_v53 = vpack.c.bf16 %v258_v50, %v257_v49  ;;  %v248_v54 = vmul.f32 %v666_v32, %v237_v51  ;;  %707 = vmatprep.subr.bf16.mxu0 %v783_v60 }
 0x218   :  { %677 = vmatmul.mubr.msk.bf16.gmra.mxu1 %vm98_vm1, %v261_v53  ;;  %v259_v52 = vadd.f32 %v667_v36, %v248_v54 }
 0x219   :  { %384 = vmatprep.mubr.bf16.mxu1 %v827_v10  ;;  %708 = vmatpush3.bf16.msra.mxu0 %v784_v61  ;;  %v275_v10 = vsub.s32 0, %v274_v9 }
 0x21a   :  { %v262_v55 = vpack.c.bf16 %v259_v52, %v259_v52  ;;  %709 = vmatprep.subr.bf16.mxu0 %v785_v62 }
 0x21b   :  { %v276_v14 = vrot.slane %v271_v11, %v275_v10 }
 0x21d   :  { %710 = vmatpush3.bf16.msra.mxu0 %v786_v63 }
 0x21e   :  { %711 = vmatprep.subr.bf16.mxu0 %v787_v0 }
 0x220   :  { %678 = vmatmul.mubr.msk.bf16.gmra.mxu1 %vm98_vm1, %v262_v55 }
 0x221   :  { %712 = vmatpush3.bf16.msra.mxu0 %v788_v1 }
 0x222   :  { %713 = vmatprep.subr.bf16.mxu0 %v789_v2 }
 0x225   :  { %714 = vmatpush3.bf16.msra.mxu0 %v790_v3 }
 0x226   :  { %715 = vmatprep.subr.bf16.mxu0 %v791_v4 }
 0x229   :  { %716 = vmatpush3.bf16.msra.mxu0 %v792_v5 }
 0x22a   :  { %717 = vmatprep.subr.bf16.mxu0 %v793_v6 }
 0x22d   :  { %718 = vmatpush3.bf16.msra.mxu0 %v794_v7 }
 0x2d0   :  { %v366_v16 = vpop.f32.mrf.mxu1 }
 0x2d1   :  { %v367_v17 = vadd.f32 %v366_v16, %v276_v14 }
 0x2d2   :  { %v368_v18 = vpop.f32.mrf.mxu1 }
 0x2d3   :  { %v369_v20 = vadd.f32 %v368_v18, %v280_v15  ;;  %v404_v21 = vmul.f32 0.70710677, %v367_v17  ;;  %v393_v63 = vmul.f32 0.5, %v367_v17 }
 0x2d4   :  { %v370_v22 = vpop.f32.mrf.mxu1 }
 0x2d5   :  { %v405_v23 = vmul.f32 0.70710677, %v369_v20  ;;  %v371_v24 = vadd.f32 %v370_v22, %v276_v14  ;;  %v394_v60 = vmul.f32 0.5, %v369_v20 }
 0x2d6   :  { %v372_v26 = vpop.f32.mrf.mxu1 }
 0x2d7   :  { %805 = verf.f32 %v405_v23  ;;  %v406_v27 = vmul.f32 0.70710677, %v371_v24  ;;  %v373_v28 = vadd.f32 %v372_v26, %v280_v15  ;;  %v395_v59 = vmul.f32 0.5, %v371_v24 }
 0x2d8   :  { %807 = verf.f32 %v404_v21  ;;  %v376_v29 = vpop.f32.mrf.mxu1 }
 0x2d9   :  { %809 = verf.f32 %v406_v27  ;;  %v407_v30 = vmul.f32 0.70710677, %v373_v28  ;;  %v377_v32 = vadd.f32 %v376_v29, %v276_v14  ;;  %v396_v61 = vmul.f32 0.5, %v373_v28 }
 0x2da   :  { %v378_v33 = vpop.f32.mrf.mxu1 }
 0x2db   :  { %811 = verf.f32 %v407_v30  ;;  %v379_v34 = vadd.f32 %v378_v33, %v280_v15  ;;  %v408_v35 = vmul.f32 0.70710677, %v377_v32  ;;  %v397_v17 = vmul.f32 0.5, %v377_v32 }
 0x2dc   :  { %v380_v36 = vpop.f32.mrf.mxu1 }
 0x2dd   :  { %v409_v38 = vmul.f32 0.70710677, %v379_v34  ;;  %v381_v39 = vadd.f32 %v380_v36, %v276_v14 }
 0x2de   :  { %v382_v40 = vpop.f32.mrf.mxu1 }
 0x2df   :  { %813 = verf.f32 %v409_v38  ;;  %v410_v41 = vmul.f32 0.70710677, %v381_v39  ;;  %v383_v42 = vadd.f32 %v382_v40, %v280_v15  ;;  %v679_v40 = vld [vmem:[%s1104_s9] ss:$0 sm:$0xff] }
 0x2e0   :  { %815 = verf.f32 %v408_v35  ;;  %v386_v43 = vpop.f32.mrf.mxu1 }
 0x2e1   :  { %817 = verf.f32 %v410_v41  ;;  %v411_v44 = vmul.f32 0.70710677, %v383_v42  ;;  %v387_v45 = vadd.f32 %v386_v43, %v276_v14  ;;  %v399_v14 = vmul.f32 0.5, %v381_v39 }
 0x2e2   :  { %v388_v46 = vpop.f32.mrf.mxu1  ;;  %v400_v16 = vmul.f32 0.5, %v383_v42 }
 0x2e3   :  { %819 = verf.f32 %v411_v44  ;;  %v412_v48 = vmul.f32 0.70710677, %v387_v45  ;;  %v389_v49 = vadd.f32 %v388_v46, %v280_v15  ;;  %v398_v15 = vmul.f32 0.5, %v379_v34 }
 0x2e4   :  { %v806_v47 = vpop.eup %805  ;;  %v390_v50 = vpop.f32.mrf.mxu1  ;;  %v401_v35 = vmul.f32 0.5, %v387_v45 }
 0x2e5   :  { %v808_v51 = vpop.eup %807  ;;  %821 = verf.f32 %v412_v48  ;;  %v413_v54 = vmul.f32 0.70710677, %v389_v49  ;;  %v425_v56 = vadd.f32 1.0, %v806_v47  ;;  %v402_v28 = vmul.f32 0.5, %v389_v49 }
 0x2e6   :  { %v810_v53 = vpop.eup %809  ;;  %v391_v52 = vpop.f32.mrf.mxu1  ;;  %v424_v58 = vadd.f32 1.0, %v808_v51 }
 0x2e7   :  { %v426_v55 = vadd.f32 1.0, %v810_v53  ;;  %823 = verf.f32 %v413_v54  ;;  %v435_v1 = vmul.f32 %v425_v56, %v394_v60 }
 0x2e8   :  { %v812_v57 = vpop.eup %811  ;;  %v434_v4 = vmul.f32 %v424_v58, %v393_v63 }
 0x2e9   :  { %v427_v62 = vadd.f32 1.0, %v812_v57  ;;  %v436_v0 = vmul.f32 %v426_v55, %v395_v59 }
 0x2eb   :  { %v437_v2 = vmul.f32 %v427_v62, %v396_v61  ;;  %v444_v8 = vpack.c.bf16 %v436_v0, %v434_v4 }
 0x2ec   :  { %v814_v3 = vpop.eup %813 }
 0x2ed   :  { %v816_v5 = vpop.eup %815  ;;  %v445_v6 = vpack.c.bf16 %v437_v2, %v435_v1  ;;  %v429_v9 = vadd.f32 1.0, %v814_v3 }
 0x2ee   :  { %v818_v7 = vpop.eup %817  ;;  %v428_v12 = vadd.f32 1.0, %v816_v5 }
 0x2ef   :  { %v430_v10 = vadd.f32 1.0, %v818_v7  ;;  %617 = vmatprep.mubr.bf16.mxu0 %v445_v6  ;;  %v439_v22 = vmul.f32 %v429_v9, %v398_v15 }
 0x2f0   :  { %v820_v11 = vpop.eup %819  ;;  %618 = vmatmul.mubr.bf16.vlgmr.msra.gmra.mxu0 %v444_v8  ;;  %v438_v24 = vmul.f32 %v428_v12, %v397_v17 }
 0x2f1   :  { %v431_v18 = vadd.f32 1.0, %v820_v11  ;;  %v440_v20 = vmul.f32 %v430_v10, %v399_v14 }
 0x2f2   :  { %v822_v21 = vpop.eup %821 }
 0x2f3   :  { %v441_v23 = vmul.f32 %v431_v18, %v400_v16  ;;  %v446_v29 = vpack.c.bf16 %v440_v20, %v438_v24  ;;  %v432_v33 = vadd.f32 1.0, %v822_v21 }
 0x2f4   :  { %v824_v26 = vpop.eup %823 }
 0x2f5   :  { %v447_v27 = vpack.c.bf16 %v441_v23, %v439_v22  ;;  %v433_v30 = vadd.f32 1.0, %v824_v26  ;;  %v442_v34 = vmul.f32 %v432_v33, %v401_v35 }
 0x2f7   :  { %625 = vmatprep.mubr.bf16.mxu0 %v447_v27  ;;  %v443_v36 = vmul.f32 %v433_v30, %v402_v28  ;;  %v448_v39 = vpack.c.bf16 %v442_v34, %v442_v34 }
 0x2f8   :  { %626 = vmatmul.mubr.bf16.gmra.mxu0 %v446_v29 }
 0x2f9   :  { %v449_v38 = vpack.c.bf16 %v443_v36, %v443_v36 }
 0x2fb   :  { %633 = vmatprep.mubr.bf16.mxu0 %v449_v38 }
 0x300   :  { %634 = vmatmul.mubr.bf16.gmra.mxu0 %v448_v39 }
 0x3b0   :  { %v719_v32 = vpop.f32.mrf.mxu0 }
 0x3b2   :  { %v720_v41 = vpop.f32.mrf.mxu0 }
 0x3b3   :  { %v721_v42 = vadd.f32 %v720_v41, %v719_v32 }
 0x3b4   :  { %v722_v43 = vpop.f32.mrf.mxu0 }
 0x3b5   :  { %v620_v44 = vadd.f32 %v721_v42, %v679_v40 }
 0x3b6   :  { %v723_v46 = vpop.f32.mrf.mxu0 }
 0x3b7   :  { %v641_v48 = vadd.f32 %v620_v44, %v916_v13  ;;  %v724_v45 = vadd.f32 %v723_v46, %v722_v43 }
 0x3b8   :  { %v725_v47 = vpop.f32.mrf.mxu0 }
 0x3b9   :  { %646 = vst.msk [vmem:[%s1105_s10] sm:$0xff] %vm98_vm1, %v641_v48  ;;  %v623_v49 = vadd.f32 %v724_v45, %v679_v40 }
 0x3ba   :  { %v726_v50 = vpop.f32.mrf.mxu0 }
 0x3bb   :  { %v642_v51 = vadd.f32 %v623_v49, %v923_v19  ;;  %v727_v53 = vadd.f32 %v726_v50, %v725_v47 }
 0x3bc   :  { %v728_v54 = vpop.f32.mrf.mxu0 }
 0x3bd   :  { %647 = vst.msk [vmem:[%s1105_s10 + $0x8] sm:$0xff] %vm98_vm1, %v642_v51  ;;  %v628_v52 = vadd.f32 %v727_v53, %v679_v40 }
 0x3be   :  { %v729_v13 = vpop.f32.mrf.mxu0 }
 0x3bf   :  { %v643_v55 = vadd.f32 %v628_v52, %v930_v25  ;;  %v730_v56 = vadd.f32 %v729_v13, %v728_v54 }
 0x3c0   :  { %v731_v57 = vpop.f32.mrf.mxu0 }
 0x3c1   :  { %648 = vst.msk [vmem:[%s1105_s10 + $0x10] sm:$0xff] %vm98_vm1, %v643_v55  ;;  %v631_v58 = vadd.f32 %v730_v56, %v679_v40 }
 0x3c2   :  { %v732_v19 = vpop.f32.mrf.mxu0 }
 0x3c3   :  { %v644_v59 = vadd.f32 %v631_v58, %v937_v31  ;;  %v733_v60 = vadd.f32 %v732_v19, %v731_v57 }
 0x3c4   :  { %v734_v61 = vpop.f32.mrf.mxu0 }
 0x3c5   :  { %649 = vst.msk [vmem:[%s1105_s10 + $0x18] sm:$0xff] %vm98_vm1, %v644_v59  ;;  %v636_v62 = vadd.f32 %v733_v60, %v679_v40 }
 0x3c6   :  { %v735_v25 = vpop.f32.mrf.mxu0 }
 0x3c7   :  { %v645_v63 = vadd.f32 %v636_v62, %v944_v37 }
 0x3c9   :  { %650 = vst.msk [vmem:[%s1105_s10 + $0x20] sm:$0x3] %vm183_vm2, %v645_v63 }

</bundles_post_ra>
